<compile_context>
chip_gen: v7x
topology: tpu7x:2x2x1
jax: 0.10.0
libtpu: 0.0.40
codegen_flags: <defaults>
</compile_context>

<pallas_src>
import functools

import numpy as np
import jax
import jax.numpy as jnp
from jax.experimental import pallas as pl
from jax.experimental.pallas import tpu as pltpu

EPS = 1e-5
LANE = 128
K1PAD, N1PAD, N2PAD, N3PAD, CPAD = 128, 256, 384, 128, 128
NEG_BIG = -1e9

C_IN, C1, C2, C3, N_CLS = 10, 16, 32, 32, 3


# ----------------------------------------------------------------------------
# Pallas kernel: conv1+bn1+relu -> conv2+bn2+relu -> conv3+relu -> fc1 -> softmax
# ----------------------------------------------------------------------------
def vanila_kernel(x_ref, m1_ref, e1_ref, m2_ref, e2_ref, m3_ref, w4_ref, vec_ref,
                  o_ref, *, inv_n):
    x = x_ref[...]                  # (B, 128) f32
    vec = vec_ref[...]              # (8, 128) f32: rows = g1, be1, g2, be2, cb3, b4

    def conv_bn_relu(h, m_ref, e_ref, g_row, be_row):
        # conv (same-padding on the 3x3 grid) pre-lowered to one padded matmul.
        # conv bias omitted: training-mode BN mean subtraction cancels it exactly.
        y = jnp.dot(h, m_ref[...], preferred_element_type=jnp.float32)      # (B, Npad)

        # 0/1 channel gather matrix, stored bf16 (exact), cast once and reused
        # for both the gather (E) and the broadcast (E^T) contraction.
        e = e_ref[...].astype(jnp.float32)                                   # (Npad, CPAD)

        # Per-channel batch statistics over (N, H, W): one fused (2,Npad)@E.
        s = jnp.sum(y, axis=0, keepdims=True)
        ssq = jnp.sum(y * y, axis=0, keepdims=True)
        stats = jnp.concatenate([s, ssq], axis=0) * inv_n                    # (2, Npad)
        ch = jnp.dot(stats, e, preferred_element_type=jnp.float32)           # (2, CPAD)
        ch_mean = ch[0:1, :]
        ch_var = jnp.maximum(ch[1:2, :] - ch_mean * ch_mean, 0.0)            # biased var
        # TODO(synk): E[y^2]-mean^2 can cancel catastrophically at much larger
        # activation scales; move to a two-pass formulation if reused there.

        # Fold BN affine into channel-level scale/shift; broadcast back to the
        # flat positions by contracting against E transposed (no extra DMA).
        ch_scale = jax.lax.rsqrt(ch_var + EPS) * g_row                       # (1, CPAD)
        ch_shift = be_row - ch_mean * ch_scale                               # (1, CPAD)
        sc_sh = jnp.concatenate([ch_scale, ch_shift], axis=0)                # (2, CPAD)
        bcast = jax.lax.dot_general(
            sc_sh, e, dimension_numbers=(((1,), (1,)), ((), ())),
            preferred_element_type=jnp.float32)                              # (2, Npad)
        return jnp.maximum(y * bcast[0:1, :] + bcast[1:2, :], 0.0)

    h1 = conv_bn_relu(x, m1_ref, e1_ref, vec[0:1, :], vec[1:2, :])           # (B, 256)
    h2 = conv_bn_relu(h1, m2_ref, e2_ref, vec[2:3, :], vec[3:4, :])          # (B, 384)

    # conv3: valid 3x3 on the 3x3 grid -> 1x1 spatial == plain matmul, + bias + relu.
    h3 = jnp.maximum(
        jnp.dot(h2, m3_ref[...], preferred_element_type=jnp.float32) + vec[4:5, :],
        0.0)                                                                 # (B, 128)

    # fc1 + softmax; padded logit lanes carry -1e9 bias -> exp underflows to 0.
    logits = jnp.dot(h3, w4_ref[...], preferred_element_type=jnp.float32) + vec[5:6, :]
    mx = jnp.max(logits, axis=-1, keepdims=True)
    ez = jnp.exp(logits - mx)
    denom = jnp.sum(ez, axis=-1, keepdims=True)
    o_ref[...] = ez * pl.reciprocal(denom, approx=False)


# ----------------------------------------------------------------------------
# Host-side lowering (runs ONCE per parameter set)
# ----------------------------------------------------------------------------
def conv3x3_pad1_as_matmul(w, kpad, npad):
    """w: (Cout, Cin, 3, 3) -> (kpad, npad); same-padding 3x3 conv on the 3x3 grid."""
    cout, cin, _, _ = w.shape
    m = np.zeros((kpad, npad), dtype=np.float32)
    for i in range(3):
        for j in range(3):
            p = i * 3 + j
            for kh in range(3):
                for kw in range(3):
                    ii, jj = i + kh - 1, j + kw - 1
                    if 0 <= ii < 3 and 0 <= jj < 3:
                        q = ii * 3 + jj
                        m[q * cin:(q + 1) * cin, p * cout:(p + 1) * cout] += w[:, :, kh, kw].T
    return m


def conv3x3_valid_as_matmul(w, kpad, npad):
    """w: (Cout, Cin, 3, 3) -> (kpad, npad); output spatial is 1x1."""
    cout, cin, _, _ = w.shape
    m = np.zeros((kpad, npad), dtype=np.float32)
    m[:9 * cin, :cout] = np.transpose(w, (2, 3, 1, 0)).reshape(9 * cin, cout)
    return m


def make_channel_gather(cout, npad, cpad):
    """(npad, cpad) 0/1 matrix mapping flat position p*cout+c -> channel c."""
    e = np.zeros((npad, cpad), dtype=np.float32)
    for p in range(9):
        for c in range(cout):
            e[p * cout + c, c] = 1.0
    return e


def lower_params(params):
    (w1, _b1, g1, be1, w2, _b2, g2, be2, w3, b3, w4, b4) = [
        np.asarray(p, np.float32) for p in params]
    # conv1/conv2 biases (_b1/_b2) are dropped: cancelled by training-mode BN.

    m1 = conv3x3_pad1_as_matmul(w1, K1PAD, N1PAD)          # (128, 256)
    m2 = conv3x3_pad1_as_matmul(w2, N1PAD, N2PAD)          # (256, 384)
    m3 = conv3x3_valid_as_matmul(w3, N2PAD, N3PAD)         # (384, 128)
    e1 = make_channel_gather(C1, N1PAD, CPAD)              # (256, 128) exact 0/1
    e2 = make_channel_gather(C2, N2PAD, CPAD)              # (384, 128) exact 0/1

    w4m = np.zeros((N3PAD, LANE), np.float32)              # (128, 128)
    w4m[:C3, :N_CLS] = w4.T

    vecs = np.zeros((8, LANE), np.float32)                 # packed bias/affine rows
    vecs[0, :C1] = g1
    vecs[1, :C1] = be1
    vecs[2, :C2] = g2
    vecs[3, :C2] = be2
    vecs[4, :C3] = b3
    vecs[5, :] = NEG_BIG                                   # mask padded logit lanes
    vecs[5, :N_CLS] = b4

    return (jnp.asarray(m1), jnp.asarray(e1, jnp.bfloat16),
            jnp.asarray(m2), jnp.asarray(e2, jnp.bfloat16),
            jnp.asarray(m3), jnp.asarray(w4m), jnp.asarray(vecs))


def make_vanila_forward(params):
    consts = lower_params(params)   # device-resident, built once

    @jax.jit
    def forward(x_nhwc, m1, e1, m2, e2, m3, w4m, vecs):
        batch = x_nhwc.shape[0]
        inv_n = 1.0 / float(batch * 9)   # static under jit (shape-derived)

        # permute(0,3,1,2) + crop[:, :, 3:6, 3:6] in NCHW == NHWC crop [:, 3:6, 3:6, :];
        # flatten (h, w, c)-major to p*Cin + c, zero-pad lanes to 128.
        x_crop = x_nhwc[:, 3:6, 3:6, :].astype(jnp.float32).reshape(batch, 9 * C_IN)
        x_flat = jnp.pad(x_crop, ((0, 0), (0, K1PAD - 9 * C_IN)))

        args = (x_flat, m1, e1, m2, e2, m3, w4m, vecs)
        vmem_spec = pl.BlockSpec(memory_space=pltpu.MemorySpace.VMEM)
        out = pl.pallas_call(
            functools.partial(vanila_kernel, inv_n=inv_n),
            out_shape=jax.ShapeDtypeStruct((batch, LANE), jnp.float32),
            in_specs=[vmem_spec] * len(args),
            out_specs=vmem_spec,
        )(*args)
        return jnp.squeeze(out[:, :N_CLS])   # slice real classes; matches x.squeeze()

    return lambda x: forward(x, *consts)


# ----------------------------------------------------------------------------
# Pure-numpy reference replicating the PyTorch forward (training-mode BN)
# ----------------------------------------------------------------------------
def numpy_reference(x_nhwc, params):
    (w1, b1, g1, be1, w2, b2, g2, be2, w3, b3, w4, b4) = [
        np.asarray(p, np.float64) for p in params]
    x = np.transpose(np.asarray(x_nhwc, np.float64), (0, 3, 1, 2))[:, :, 3:6, 3:6]

    def conv(xx, w, b, pad):
        bsz, cin, h, wd = xx.shape
        cout = w.shape[0]
        xp = np.pad(xx, ((0, 0), (0, 0), (pad, pad), (pad, pad)))
        ho, wo = h + 2 * pad - 2, wd + 2 * pad - 2
        out = np.zeros((bsz, cout, ho, wo))
        for bb in range(bsz):
            for co in range(cout):
                for i in range(ho):
                    for j in range(wo):
                        out[bb, co, i, j] = np.sum(xp[bb, :, i:i + 3, j:j + 3] * w[co]) + b[co]
        return out

    def bn(xx, g, be):
        mean = xx.mean(axis=(0, 2, 3), keepdims=True)
        var = xx.var(axis=(0, 2, 3), keepdims=True)
        return (xx - mean) / np.sqrt(var + EPS) * g.reshape(1, -1, 1, 1) + be.reshape(1, -1, 1, 1)

    x = np.maximum(bn(conv(x, w1, b1, 1), g1, be1), 0.0)
    x = np.maximum(bn(conv(x, w2, b2, 1), g2, be2), 0.0)
    x = np.maximum(conv(x, w3, b3, 0), 0.0)
    x = x.reshape(x.shape[0], -1)
    logits = x @ w4.T + b4
    e = np.exp(logits - logits.max(axis=1, keepdims=True))
    return np.squeeze(e / e.sum(axis=1, keepdims=True))


if __name__ == "__main__":
    keys = jax.random.split(jax.random.PRNGKey(0), 13)

    def u(k, shape, lo, hi):
        return np.asarray(jax.random.uniform(k, shape, jnp.float32, lo, hi))

    # Deterministic synthetic parameters (shapes per module __init__).
    params = (
        u(keys[1], (16, 10, 3, 3), -0.2, 0.2), u(keys[2], (16,), -0.1, 0.1),   # conv1
        u(keys[3], (16,), 0.5, 1.5), u(keys[4], (16,), -0.1, 0.1),             # bn1 gamma/beta
        u(keys[5], (32, 16, 3, 3), -0.2, 0.2), u(keys[6], (32,), -0.1, 0.1),   # conv2
        u(keys[7], (32,), 0.5, 1.5), u(keys[8], (32,), -0.1, 0.1),             # bn2 gamma/beta
        u(keys[9], (32, 32, 3, 3), -0.2, 0.2), u(keys[10], (32,), -0.1, 0.1),  # conv3
        u(keys[11], (3, 32), -0.3, 0.3), u(keys[12], (3,), -0.1, 0.1),         # fc1
    )

    # Input: NHWC (forward permutes to NCHW itself); spatial must be >= 6 for the crop.
    # batch=8 fills all vreg sublanes while staying small.
    batch = 8
    x = jax.random.normal(keys[0], (batch, 8, 8, 10), jnp.float32)

    forward = make_vanila_forward(params)           # host lowering happens once here
    out = jax.block_until_ready(forward(x))         # first call: compile + run
    out2 = jax.block_until_ready(forward(x))        # cached path: no re-lowering

    ref = numpy_reference(np.asarray(x), params)
    assert out.shape == ref.shape, (out.shape, ref.shape)
    np.testing.assert_allclose(np.asarray(out), ref, atol=1e-4, rtol=1e-3)
    np.testing.assert_allclose(np.asarray(out2), np.asarray(out))
    print("KERNEL_OK")
</pallas_src>

<mosaic_0001>
module attributes {stable_mosaic.version = 11 : i64} {
  func.func @vanila_kernel(%arg0: memref<8x128xf32, #tpu.memory_space<vmem>>, %arg1: memref<128x256xf32, #tpu.memory_space<vmem>>, %arg2: memref<256x128xbf16, #tpu.memory_space<vmem>>, %arg3: memref<256x384xf32, #tpu.memory_space<vmem>>, %arg4: memref<384x128xbf16, #tpu.memory_space<vmem>>, %arg5: memref<384x128xf32, #tpu.memory_space<vmem>>, %arg6: memref<128x128xf32, #tpu.memory_space<vmem>>, %arg7: memref<8x128xf32, #tpu.memory_space<vmem>>, %arg8: memref<8x128xf32, #tpu.memory_space<vmem>>) attributes {dimension_semantics = [], scalar_prefetch = 0 : i64, scratch_operands = 0 : i64, tpu.core_type = #tpu.core_type<tc>} {
    %c0 = arith.constant 0 : index
    %c0_0 = arith.constant 0 : index
    %0 = vector.load %arg0[%c0, %c0_0] : memref<8x128xf32, #tpu.memory_space<vmem>>, vector<8x128xf32>
    %c0_1 = arith.constant 0 : index
    %c0_2 = arith.constant 0 : index
    %1 = vector.load %arg7[%c0_1, %c0_2] : memref<8x128xf32, #tpu.memory_space<vmem>>, vector<8x128xf32>
    %2 = vector.extract_strided_slice %1 {offsets = [0, 0], sizes = [1, 128], strides = [1, 1]} : vector<8x128xf32> to vector<1x128xf32>
    %3 = vector.extract_strided_slice %1 {offsets = [1, 0], sizes = [1, 128], strides = [1, 1]} : vector<8x128xf32> to vector<1x128xf32>
    %c0_3 = arith.constant 0 : index
    %c0_4 = arith.constant 0 : index
    %4 = vector.load %arg1[%c0_3, %c0_4] : memref<128x256xf32, #tpu.memory_space<vmem>>, vector<128x256xf32>
    %cst = arith.constant dense<0.000000e+00> : vector<8x256xf32>
    %5 = tpu.matmul %0, %4, %cst {dimension_numbers = #tpu.dot_dimension_numbers<[1], [0], [0], [1], [0, 0, 1, 1], [], []>} : vector<8x128xf32>, vector<128x256xf32>, vector<8x256xf32> -> vector<8x256xf32>
    %c0_5 = arith.constant 0 : index
    %c0_6 = arith.constant 0 : index
    %6 = vector.load %arg2[%c0_5, %c0_6] : memref<256x128xbf16, #tpu.memory_space<vmem>>, vector<256x128xbf16>
    %7 = arith.extf %6 : vector<256x128xbf16> to vector<256x128xf32>
    %cst_7 = arith.constant dense<0.000000e+00> : vector<256xf32>
    %8 = vector.multi_reduction <add>, %5, %cst_7 [0] : vector<8x256xf32> to vector<256xf32>
    %9 = vector.shape_cast %8 : vector<256xf32> to vector<1x256xf32>
    %10 = arith.mulf %5, %5 : vector<8x256xf32>
    %cst_8 = arith.constant dense<0.000000e+00> : vector<256xf32>
    %11 = vector.multi_reduction <add>, %10, %cst_8 [0] : vector<8x256xf32> to vector<256xf32>
    %12 = vector.shape_cast %11 : vector<256xf32> to vector<1x256xf32>
    %13 = tpu.concatenate %9, %12 in 0 : vector<1x256xf32>, vector<1x256xf32> -> vector<2x256xf32>
    %cst_9 = arith.constant 0.013888889 : f32
    %14 = vector.broadcast %cst_9 : f32 to vector<2x256xf32>
    %15 = arith.mulf %13, %14 : vector<2x256xf32>
    %cst_10 = arith.constant dense<0.000000e+00> : vector<2x128xf32>
    %16 = tpu.matmul %15, %7, %cst_10 {dimension_numbers = #tpu.dot_dimension_numbers<[1], [0], [0], [1], [0, 0, 1, 1], [], []>} : vector<2x256xf32>, vector<256x128xf32>, vector<2x128xf32> -> vector<2x128xf32>
    %17 = vector.extract_strided_slice %16 {offsets = [0, 0], sizes = [1, 128], strides = [1, 1]} : vector<2x128xf32> to vector<1x128xf32>
    %18 = vector.extract_strided_slice %16 {offsets = [1, 0], sizes = [1, 128], strides = [1, 1]} : vector<2x128xf32> to vector<1x128xf32>
    %19 = arith.mulf %17, %17 : vector<1x128xf32>
    %20 = arith.subf %18, %19 : vector<1x128xf32>
    %cst_11 = arith.constant 0.000000e+00 : f32
    %21 = vector.broadcast %cst_11 : f32 to vector<1x128xf32>
    %22 = arith.maximumf %20, %21 : vector<1x128xf32>
    %cst_12 = arith.constant 9.99999974E-6 : f32
    %23 = vector.broadcast %cst_12 : f32 to vector<1x128xf32>
    %24 = arith.addf %22, %23 : vector<1x128xf32>
    %25 = math.rsqrt %24 : vector<1x128xf32>
    %26 = arith.mulf %25, %2 : vector<1x128xf32>
    %27 = arith.mulf %17, %26 : vector<1x128xf32>
    %28 = arith.subf %3, %27 : vector<1x128xf32>
    %29 = tpu.concatenate %26, %28 in 0 : vector<1x128xf32>, vector<1x128xf32> -> vector<2x128xf32>
    %cst_13 = arith.constant dense<0.000000e+00> : vector<2x256xf32>
    %30 = tpu.matmul %29, %7, %cst_13 {dimension_numbers = #tpu.dot_dimension_numbers<[1], [1], [0], [0], [0, 0, 1, 0], [], []>} : vector<2x128xf32>, vector<256x128xf32>, vector<2x256xf32> -> vector<2x256xf32>
    %31 = vector.extract_strided_slice %30 {offsets = [0, 0], sizes = [1, 256], strides = [1, 1]} : vector<2x256xf32> to vector<1x256xf32>
    %32 = vector.broadcast %31 : vector<1x256xf32> to vector<8x256xf32>
    %33 = arith.mulf %5, %32 : vector<8x256xf32>
    %34 = vector.extract_strided_slice %30 {offsets = [1, 0], sizes = [1, 256], strides = [1, 1]} : vector<2x256xf32> to vector<1x256xf32>
    %35 = vector.broadcast %34 : vector<1x256xf32> to vector<8x256xf32>
    %36 = arith.addf %33, %35 : vector<8x256xf32>
    %cst_14 = arith.constant 0.000000e+00 : f32
    %37 = vector.broadcast %cst_14 : f32 to vector<8x256xf32>
    %38 = arith.maximumf %36, %37 : vector<8x256xf32>
    %39 = vector.extract_strided_slice %1 {offsets = [2, 0], sizes = [1, 128], strides = [1, 1]} : vector<8x128xf32> to vector<1x128xf32>
    %40 = vector.extract_strided_slice %1 {offsets = [3, 0], sizes = [1, 128], strides = [1, 1]} : vector<8x128xf32> to vector<1x128xf32>
    %c0_15 = arith.constant 0 : index
    %c0_16 = arith.constant 0 : index
    %41 = vector.load %arg3[%c0_15, %c0_16] : memref<256x384xf32, #tpu.memory_space<vmem>>, vector<256x384xf32>
    %cst_17 = arith.constant dense<0.000000e+00> : vector<8x384xf32>
    %42 = tpu.matmul %38, %41, %cst_17 {dimension_numbers = #tpu.dot_dimension_numbers<[1], [0], [0], [1], [0, 0, 1, 1], [], []>} : vector<8x256xf32>, vector<256x384xf32>, vector<8x384xf32> -> vector<8x384xf32>
    %c0_18 = arith.constant 0 : index
    %c0_19 = arith.constant 0 : index
    %43 = vector.load %arg4[%c0_18, %c0_19] : memref<384x128xbf16, #tpu.memory_space<vmem>>, vector<384x128xbf16>
    %44 = arith.extf %43 : vector<384x128xbf16> to vector<384x128xf32>
    %cst_20 = arith.constant dense<0.000000e+00> : vector<384xf32>
    %45 = vector.multi_reduction <add>, %42, %cst_20 [0] : vector<8x384xf32> to vector<384xf32>
    %46 = vector.shape_cast %45 : vector<384xf32> to vector<1x384xf32>
    %47 = arith.mulf %42, %42 : vector<8x384xf32>
    %cst_21 = arith.constant dense<0.000000e+00> : vector<384xf32>
    %48 = vector.multi_reduction <add>, %47, %cst_21 [0] : vector<8x384xf32> to vector<384xf32>
    %49 = vector.shape_cast %48 : vector<384xf32> to vector<1x384xf32>
    %50 = tpu.concatenate %46, %49 in 0 : vector<1x384xf32>, vector<1x384xf32> -> vector<2x384xf32>
    %cst_22 = arith.constant 0.013888889 : f32
    %51 = vector.broadcast %cst_22 : f32 to vector<2x384xf32>
    %52 = arith.mulf %50, %51 : vector<2x384xf32>
    %cst_23 = arith.constant dense<0.000000e+00> : vector<2x128xf32>
    %53 = tpu.matmul %52, %44, %cst_23 {dimension_numbers = #tpu.dot_dimension_numbers<[1], [0], [0], [1], [0, 0, 1, 1], [], []>} : vector<2x384xf32>, vector<384x128xf32>, vector<2x128xf32> -> vector<2x128xf32>
    %54 = vector.extract_strided_slice %53 {offsets = [0, 0], sizes = [1, 128], strides = [1, 1]} : vector<2x128xf32> to vector<1x128xf32>
    %55 = vector.extract_strided_slice %53 {offsets = [1, 0], sizes = [1, 128], strides = [1, 1]} : vector<2x128xf32> to vector<1x128xf32>
    %56 = arith.mulf %54, %54 : vector<1x128xf32>
    %57 = arith.subf %55, %56 : vector<1x128xf32>
    %cst_24 = arith.constant 0.000000e+00 : f32
    %58 = vector.broadcast %cst_24 : f32 to vector<1x128xf32>
    %59 = arith.maximumf %57, %58 : vector<1x128xf32>
    %cst_25 = arith.constant 9.99999974E-6 : f32
    %60 = vector.broadcast %cst_25 : f32 to vector<1x128xf32>
    %61 = arith.addf %59, %60 : vector<1x128xf32>
    %62 = math.rsqrt %61 : vector<1x128xf32>
    %63 = arith.mulf %62, %39 : vector<1x128xf32>
    %64 = arith.mulf %54, %63 : vector<1x128xf32>
    %65 = arith.subf %40, %64 : vector<1x128xf32>
    %66 = tpu.concatenate %63, %65 in 0 : vector<1x128xf32>, vector<1x128xf32> -> vector<2x128xf32>
    %cst_26 = arith.constant dense<0.000000e+00> : vector<2x384xf32>
    %67 = tpu.matmul %66, %44, %cst_26 {dimension_numbers = #tpu.dot_dimension_numbers<[1], [1], [0], [0], [0, 0, 1, 0], [], []>} : vector<2x128xf32>, vector<384x128xf32>, vector<2x384xf32> -> vector<2x384xf32>
    %68 = vector.extract_strided_slice %67 {offsets = [0, 0], sizes = [1, 384], strides = [1, 1]} : vector<2x384xf32> to vector<1x384xf32>
    %69 = vector.broadcast %68 : vector<1x384xf32> to vector<8x384xf32>
    %70 = arith.mulf %42, %69 : vector<8x384xf32>
    %71 = vector.extract_strided_slice %67 {offsets = [1, 0], sizes = [1, 384], strides = [1, 1]} : vector<2x384xf32> to vector<1x384xf32>
    %72 = vector.broadcast %71 : vector<1x384xf32> to vector<8x384xf32>
    %73 = arith.addf %70, %72 : vector<8x384xf32>
    %cst_27 = arith.constant 0.000000e+00 : f32
    %74 = vector.broadcast %cst_27 : f32 to vector<8x384xf32>
    %75 = arith.maximumf %73, %74 : vector<8x384xf32>
    %c0_28 = arith.constant 0 : index
    %c0_29 = arith.constant 0 : index
    %76 = vector.load %arg5[%c0_28, %c0_29] : memref<384x128xf32, #tpu.memory_space<vmem>>, vector<384x128xf32>
    %cst_30 = arith.constant dense<0.000000e+00> : vector<8x128xf32>
    %77 = tpu.matmul %75, %76, %cst_30 {dimension_numbers = #tpu.dot_dimension_numbers<[1], [0], [0], [1], [0, 0, 1, 1], [], []>} : vector<8x384xf32>, vector<384x128xf32>, vector<8x128xf32> -> vector<8x128xf32>
    %78 = vector.extract_strided_slice %1 {offsets = [4, 0], sizes = [1, 128], strides = [1, 1]} : vector<8x128xf32> to vector<1x128xf32>
    %79 = vector.broadcast %78 : vector<1x128xf32> to vector<8x128xf32>
    %80 = arith.addf %77, %79 : vector<8x128xf32>
    %cst_31 = arith.constant 0.000000e+00 : f32
    %81 = vector.broadcast %cst_31 : f32 to vector<8x128xf32>
    %82 = arith.maximumf %80, %81 : vector<8x128xf32>
    %c0_32 = arith.constant 0 : index
    %c0_33 = arith.constant 0 : index
    %83 = vector.load %arg6[%c0_32, %c0_33] : memref<128x128xf32, #tpu.memory_space<vmem>>, vector<128x128xf32>
    %cst_34 = arith.constant dense<0.000000e+00> : vector<8x128xf32>
    %84 = tpu.matmul %82, %83, %cst_34 {dimension_numbers = #tpu.dot_dimension_numbers<[1], [0], [0], [1], [0, 0, 1, 1], [], []>} : vector<8x128xf32>, vector<128x128xf32>, vector<8x128xf32> -> vector<8x128xf32>
    %85 = vector.extract_strided_slice %1 {offsets = [5, 0], sizes = [1, 128], strides = [1, 1]} : vector<8x128xf32> to vector<1x128xf32>
    %86 = vector.broadcast %85 : vector<1x128xf32> to vector<8x128xf32>
    %87 = arith.addf %84, %86 : vector<8x128xf32>
    %cst_35 = arith.constant dense<0xFF800000> : vector<8xf32>
    %88 = vector.multi_reduction <maximumf>, %87, %cst_35 [1] : vector<8x128xf32> to vector<8xf32>
    %89 = vector.shape_cast %88 : vector<8xf32> to vector<8x1xf32>
    %90 = vector.broadcast %89 : vector<8x1xf32> to vector<8x128xf32>
    %91 = arith.subf %87, %90 : vector<8x128xf32>
    %92 = math.exp %91 : vector<8x128xf32>
    %cst_36 = arith.constant dense<0.000000e+00> : vector<8xf32>
    %93 = vector.multi_reduction <add>, %92, %cst_36 [1] : vector<8x128xf32> to vector<8xf32>
    %94 = vector.shape_cast %93 : vector<8xf32> to vector<8x1xf32>
    %95 = tpu.reciprocal %94 : vector<8x1xf32> -> vector<8x1xf32>
    %96 = vector.broadcast %95 : vector<8x1xf32> to vector<8x128xf32>
    %97 = arith.mulf %92, %96 : vector<8x128xf32>
    %c0_37 = arith.constant 0 : index
    %c0_38 = arith.constant 0 : index
    %98 = vector.load %arg8[%c0_37, %c0_38] : memref<8x128xf32, #tpu.memory_space<vmem>>, vector<8x128xf32>
    tpu.vector_store %arg8[%c0_37, %c0_38], %97 {strides = array<i32>} : memref<8x128xf32, #tpu.memory_space<vmem>>, vector<8x128xf32>,
    return
  }
}

</mosaic_0001>

<bundles_post_ra>
// kernel: forward.1
= control target key start
LH: loop header
LB: loop body
LE: loop exit
PB: predicated region body
PF: predicated region fallthrough
CT: control target
= control target key end

     0   :  { %13 = vsyncpa [#allocation3], 0  ;;  %s3069_s0 = inlined_call_operand.vmem [shape: f32[8,128], index: 0, kind: input, shape index: {}]   ;;  %s3070_s1 = inlined_call_operand.vmem [shape: f32[128,256], index: 1, kind: input, shape index: {}]   ;;  %s3071_s2 = inlined_call_operand.hbm [shape: bf16[256,128], index: 2, kind: input, shape index: {}]   ;;  %s3072_s3 = inlined_call_operand.hbm [shape: f32[256,384], index: 3, kind: input, shape index: {}]   ;;  %s3073_s4 = inlined_call_operand.hbm [shape: bf16[384,128], index: 4, kind: input, shape index: {}]   ;;  %s3074_s5 = inlined_call_operand.hbm [shape: f32[384,128], index: 5, kind: input, shape index: {}]   ;;  %s3075_s6 = inlined_call_operand.hbm [shape: f32[128,128], index: 6, kind: input, shape index: {}]   ;;  %s3076_s7 = inlined_call_operand.vmem [shape: f32[8,128], index: 7, kind: input, shape index: {}]   ;;  %s3077_s8 = inlined_call_operand.vmem [shape: f32[8,128], index: 8, kind: output, shape index: {}]  }
   0x1   :  { %14 = vsyncpa [#allocation5], 0 }
   0x2   :  { %15 = vsyncpa [#allocation8], 0  ;;  %s2632_s27 = smov [#allocation4]   ;;  %s2516_s9 = scalar_lea.hbm %s3072_s3, 12288 }
   0x3   :  { %s37_s28 = sshll.u32 %s2632_s27, 4  ;;  %p2517_p0 = scmp.ne.s32.totalorder %s3072_s3, %s2516_s9  ;;  %s38_s28 = int_to_ptr.vmem [resolvable:$true] %s37_s28 }
   0x4   :  { %p2520_p1 = scmp.lt.u32.totalorder %s2516_s9, %s3072_s3 }
   0x6   :  { %p2522_p2 = pnand %p2520_p1, %p2517_p0 }
   0x8   :  { %2525 = shalt.err (!%p2522_p2)
}
   0x9   :  { %s2526_s14 = scalar_lea.vmem %s38_s28, 12288  ;;  %p2531_p4 = scmp.lt.s32.totalorder %s38_s28, %s38_s28 }
   0xa   :  { %p2527_p3 = scmp.ne.s32.totalorder %s38_s28, %s2526_s14  ;;  %p2532_p5 = scmp.lt.s32.totalorder %s2526_s14, %s2526_s14 }
   0xc   :  { %p2533_p6 = por %p2532_p5, %p2531_p4 }
   0xe   :  { %p2534_p7 = pnand %p2533_p6, %p2527_p3 }
  0x10   :  { %2537 = shalt.err (!%p2534_p7)
}
  0x11   :  { %s2633_s15 = smov 384   ;;  %s2634_s16 = smov 24  }
  0x12   :  { %43 = dma.hbm_to_vmem [thread:$0]  %s3072_s3, 12288, %s38_s28, [#allocation5], %s2633_s15, %s2633_s15, %s2634_s16  }
  0x13   :  { %s2635_s19 = smov [#allocation7]   ;;  %s2538_s23 = scalar_lea.hbm %s3074_s5, 6144 }
  0x14   :  { %s61_s20 = sshll.u32 %s2635_s19, 4  ;;  %p2539_p8 = scmp.ne.s32.totalorder %s3074_s5, %s2538_s23  ;;  %s62_s20 = int_to_ptr.vmem [resolvable:$true] %s61_s20 }
  0x15   :  { %p2542_p9 = scmp.lt.u32.totalorder %s2538_s23, %s3074_s5 }
  0x17   :  { %p2544_p10 = pnand %p2542_p9, %p2539_p8 }
  0x19   :  { %2547 = shalt.err (!%p2544_p10)
}
  0x1a   :  { %s2548_s29 = scalar_lea.vmem %s62_s20, 6144  ;;  %p2553_p12 = scmp.lt.s32.totalorder %s62_s20, %s62_s20 }
  0x1b   :  { %p2549_p11 = scmp.ne.s32.totalorder %s62_s20, %s2548_s29  ;;  %p2554_p13 = scmp.lt.s32.totalorder %s2548_s29, %s2548_s29 }
  0x1d   :  { %p2555_p0 = por %p2554_p13, %p2553_p12 }
  0x1f   :  { %p2556_p1 = pnand %p2555_p0, %p2549_p11 }
  0x21   :  { %2559 = shalt.err (!%p2556_p1)
}
  0x22   :  { %s2636_s3 = smov 128   ;;  %s2637_s28 = smov 8  }
  0x23   :  { %67 = dma.hbm_to_vmem [thread:$0]  %s3074_s5, 6144, %s62_s20, [#allocation8], %s2636_s3, %s2636_s3, %s2637_s28  }
  0x24   :  { %s2638_s10 = smov [#allocation2]   ;;  %s2560_s14 = scalar_lea.hbm %s3071_s2, 2048 }
  0x25   :  { %s25_s11 = sshll.u32 %s2638_s10, 4  ;;  %p2561_p2 = scmp.ne.s32.totalorder %s3071_s2, %s2560_s14  ;;  %s26_s11 = int_to_ptr.vmem [resolvable:$true] %s25_s11 }
  0x26   :  { %p2564_p3 = scmp.lt.u32.totalorder %s2560_s14, %s3071_s2 }
  0x28   :  { %p2566_p4 = pnand %p2564_p3, %p2561_p2 }
  0x2a   :  { %2569 = shalt.err (!%p2566_p4)
}
  0x2b   :  { %s2570_s19 = scalar_lea.vmem %s26_s11, 2048  ;;  %p2575_p6 = scmp.lt.s32.totalorder %s26_s11, %s26_s11 }
  0x2c   :  { %p2571_p5 = scmp.ne.s32.totalorder %s26_s11, %s2570_s19  ;;  %p2576_p7 = scmp.lt.s32.totalorder %s2570_s19, %s2570_s19 }
  0x2e   :  { %p2577_p8 = por %p2576_p7, %p2575_p6 }
  0x30   :  { %p2578_p9 = pnand %p2577_p8, %p2571_p5 }
  0x32   :  { %2581 = shalt.err (!%p2578_p9)
}
  0x33   :  { %s2639_s5 = smov 64   ;;  %s2640_s20 = smov 4  }
  0x34   :  { %31 = dma.hbm_to_vmem [thread:$0]  %s3071_s2, 2048, %s26_s11, [#allocation3], %s2639_s5, %s2639_s5, %s2640_s20  }
  0x35   :  { %s2641_s23 = smov [#allocation6]   ;;  %s2642_s25 = smov [#allocation9]  }
  0x36   :  { %s49_s24 = sshll.u32 %s2641_s23, 4  ;;  %s73_s26 = sshll.u32 %s2642_s25, 4  ;;  %s50_s24 = int_to_ptr.vmem [resolvable:$true] %s49_s24  ;;  %s74_s26 = int_to_ptr.vmem [resolvable:$true] %s73_s26 }
  0x37   :  { %s2582_s30 = scalar_lea.hbm %s3073_s4, 3072 }
  0x38   :  { %p2583_p10 = scmp.ne.s32.totalorder %s3073_s4, %s2582_s30  ;;  %p2586_p11 = scmp.lt.u32.totalorder %s2582_s30, %s3073_s4 }
  0x3a   :  { %p2588_p12 = pnand %p2586_p11, %p2583_p10 }
  0x3c   :  { %2591 = shalt.err (!%p2588_p12)
}
  0x3d   :  { %s2592_s2 = scalar_lea.vmem %s50_s24, 3072  ;;  %p2597_p0 = scmp.lt.s32.totalorder %s50_s24, %s50_s24 }
  0x3e   :  { %p2593_p13 = scmp.ne.s32.totalorder %s50_s24, %s2592_s2  ;;  %p2598_p1 = scmp.lt.s32.totalorder %s2592_s2, %s2592_s2 }
  0x40   :  { %p2599_p2 = por %p2598_p1, %p2597_p0 }
  0x42   :  { %p2600_p3 = pnand %p2599_p2, %p2593_p13 }
  0x44   :  { %2603 = shalt.err (!%p2600_p3)
}
  0x45   :  { %55 = dma.hbm_to_vmem [thread:$0]  %s3073_s4, 3072, %s50_s24, [#allocation5], %s2639_s5, %s2639_s5, %s2640_s20  }
  0x46   :  { %s2604_s17 = scalar_lea.hbm %s3075_s6, 2048 }
  0x47   :  { %p2605_p4 = scmp.ne.s32.totalorder %s3075_s6, %s2604_s17  ;;  %p2608_p5 = scmp.lt.u32.totalorder %s2604_s17, %s3075_s6 }
  0x49   :  { %p2610_p6 = pnand %p2608_p5, %p2605_p4 }
  0x4b   :  { %2613 = shalt.err (!%p2610_p6)
}
  0x4c   :  { %s2614_s23 = scalar_lea.vmem %s74_s26, 2048  ;;  %p2619_p8 = scmp.lt.s32.totalorder %s74_s26, %s74_s26 }
  0x4d   :  { %p2615_p7 = scmp.ne.s32.totalorder %s74_s26, %s2614_s23  ;;  %p2620_p9 = scmp.lt.s32.totalorder %s2614_s23, %s2614_s23 }
  0x4f   :  { %p2621_p10 = por %p2620_p9, %p2619_p8 }
  0x51   :  { %p2622_p11 = pnand %p2621_p10, %p2615_p7 }
  0x53   :  { %2625 = shalt.err (!%p2622_p11)
}
  0x54   :  { %79 = dma.hbm_to_vmem [thread:$0]  %s3075_s6, 2048, %s74_s26, [#allocation8], %s2636_s3, %s2636_s3, %s2637_s28  }
  0x55   :  { %2626 = dma.done.wait [#allocation3], 2048  }
  0x56   :  { %2627 = vsyncadd [#allocation3], 4294965248 }
  0x57   :  { %2628 = dma.done.wait [#allocation5], 15360  }
  0x58   :  { %2629 = vsyncadd [#allocation5], 4294951936 }
  0x59   :  { %2630 = dma.done.wait [#allocation8], 8192  }
  0x5a   :  { %2631 = vsyncadd [#allocation8], 4294959104  ;;  %v2643_v0 = vmov 0.0   ;;  %v100_v1 = vld [vmem:[%s3070_s1 + $0x8] sm:$0xff]  ;;  %v102_v2 = vld [vmem:[%s3070_s1 + $0x18] sm:$0xff]  ;;  %vm292_vm0 = vcmask 1040384  }
  0x5b   :  { %195 = vmatprep.mubr.f32.mxu0 %v2643_v0  ;;  %v99_v3 = vld [vmem:[%s3070_s1] sm:$0xff]  ;;  %v2110_v4 = vpack.c.bf16 %v102_v2, %v100_v1  ;;  %v101_v5 = vld [vmem:[%s3070_s1 + $0x10] sm:$0xff]  ;;  %v104_v6 = vld [vmem:[%s3070_s1 + $0x28] sm:$0xff]  ;;  %vm2645_vm1 = vmmov 0  }
  0x5c   :  { %v106_v7 = vld [vmem:[%s3070_s1 + $0x38] sm:$0xff]  ;;  %v2112_v8 = vpack.c.bf16 %v101_v5, %v99_v3  ;;  %v103_v10 = vld [vmem:[%s3070_s1 + $0x20] sm:$0xff]  ;;  %v105_v11 = vld [vmem:[%s3070_s1 + $0x30] sm:$0xff] }
  0x5d   :  { %v2114_v9 = vpack.c.bf16 %v106_v7, %v104_v6  ;;  %v108_v12 = vld [vmem:[%s3070_s1 + $0x48] sm:$0xff]  ;;  %2111 = vmatprep.subr.bf16.mxu0 %v2110_v4  ;;  %v110_v13 = vld [vmem:[%s3070_s1 + $0x58] sm:$0xff]  ;;  %v2116_v14 = vpack.c.bf16 %v105_v11, %v103_v10  ;;  %v107_v16 = vld [vmem:[%s3070_s1 + $0x40] sm:$0xff] }
  0x5e   :  { %2113 = vmatpush1.bf16.msra.mxu0 %v2112_v8  ;;  %v2118_v15 = vpack.c.bf16 %v110_v13, %v108_v12  ;;  %v109_v17 = vld [vmem:[%s3070_s1 + $0x50] sm:$0xff]  ;;  %v112_v18 = vld [vmem:[%s3070_s1 + $0x68] sm:$0xff]  ;;  %v114_v19 = vld [vmem:[%s3070_s1 + $0x78] sm:$0xff] }
  0x5f   :  { %2115 = vmatprep.subr.bf16.mxu0 %v2114_v9  ;;  %v2120_v20 = vpack.c.bf16 %v109_v17, %v107_v16  ;;  %v2122_v21 = vpack.c.bf16 %v114_v19, %v112_v18  ;;  %v111_v22 = vld [vmem:[%s3070_s1 + $0x60] sm:$0xff]  ;;  %v113_v23 = vld [vmem:[%s3070_s1 + $0x70] sm:$0xff]  ;;  %v116_v24 = vld [vmem:[%s3070_s1 + $0x88] sm:$0xff] }
  0x60   :  { %v118_v25 = vld [vmem:[%s3070_s1 + $0x98] sm:$0xff]  ;;  %v1663_v26 = vld [vmem:[#allocation2 + $0x40] sm:$0xff]   ;;  %v1664_v28 = vld [vmem:[#allocation2 + $0x48] sm:$0xff]   ;;  %v2124_v29 = vpack.c.bf16 %v113_v23, %v111_v22 }
  0x61   :  { %v1497_v27 = vld [vmem:[#allocation2] sm:$0xff]   ;;  %2143 = vmatprep.subr.bf16.mxu1 %v1663_v26  ;;  %v2126_v30 = vpack.c.bf16 %v118_v25, %v116_v24  ;;  %v117_v32 = vld [vmem:[%s3070_s1 + $0x90] sm:$0xff]  ;;  %v120_v33 = vld [vmem:[%s3070_s1 + $0xa8] sm:$0xff] }
  0x62   :  { %2117 = vmatpush1.bf16.msra.mxu0 %v2116_v14  ;;  %v115_v31 = vld [vmem:[%s3070_s1 + $0x80] sm:$0xff]  ;;  %2145 = vmatpush3.bf16.msra.mxu1 %v1497_v27  ;;  %v122_v34 = vld [vmem:[%s3070_s1 + $0xb8] sm:$0xff]  ;;  %v1656_v35 = vld [vmem:[#allocation2 + $0x8] sm:$0xff]  }
  0x63   :  { %2119 = vmatprep.subr.bf16.mxu0 %v2118_v15  ;;  %2147 = vmatprep.subr.bf16.mxu1 %v1664_v28  ;;  %v1665_v36 = vld [vmem:[#allocation2 + $0x50] sm:$0xff]   ;;  %v2128_v37 = vpack.c.bf16 %v117_v32, %v115_v31  ;;  %v2130_v38 = vpack.c.bf16 %v122_v34, %v120_v33  ;;  %v119_v39 = vld [vmem:[%s3070_s1 + $0xa0] sm:$0xff]  ;;  %v124_v41 = vld [vmem:[%s3070_s1 + $0xc8] sm:$0xff] }
  0x64   :  { %v121_v40 = vld [vmem:[%s3070_s1 + $0xb0] sm:$0xff]  ;;  %v126_v42 = vld [vmem:[%s3070_s1 + $0xd8] sm:$0xff]  ;;  %v123_v46 = vld [vmem:[%s3070_s1 + $0xc0] sm:$0xff] }
  0x65   :  { %v1657_v43 = vld [vmem:[#allocation2 + $0x10] sm:$0xff]   ;;  %v2132_v44 = vpack.c.bf16 %v121_v40, %v119_v39  ;;  %v2134_v45 = vpack.c.bf16 %v126_v42, %v124_v41  ;;  %v128_v48 = vld [vmem:[%s3070_s1 + $0xe8] sm:$0xff]  ;;  %v130_v49 = vld [vmem:[%s3070_s1 + $0xf8] sm:$0xff] }
  0x66   :  { %2121 = vmatpush1.bf16.msra.mxu0 %v2120_v20  ;;  %2149 = vmatpush3.bf16.msra.mxu1 %v1656_v35  ;;  %v125_v47 = vld [vmem:[%s3070_s1 + $0xd0] sm:$0xff]  ;;  %v2138_v51 = vpack.c.bf16 %v130_v49, %v128_v48  ;;  %v127_v52 = vld [vmem:[%s3070_s1 + $0xe0] sm:$0xff]  ;;  %v1666_v56 = vld [vmem:[#allocation2 + $0x58] sm:$0xff]  }
  0x67   :  { %2123 = vmatprep.subr.bf16.mxu0 %v2122_v21  ;;  %2151 = vmatprep.subr.bf16.mxu1 %v1665_v36  ;;  %v2136_v50 = vpack.c.bf16 %v125_v47, %v123_v46  ;;  %v129_v53 = vld [vmem:[%s3070_s1 + $0xf0] sm:$0xff]  ;;  %v97_v55 = vld [vmem:[%s3069_s0] sm:$0xff]  ;;  %v1658_v57 = vld [vmem:[#allocation2 + $0x18] sm:$0xff]  }
  0x68   :  { %v2140_v54 = vpack.c.bf16 %v129_v53, %v127_v52  ;;  %v1667_v58 = vld [vmem:[#allocation2 + $0x60] sm:$0xff]   ;;  %v1668_v60 = vld [vmem:[#allocation2 + $0x68] sm:$0xff]   ;;  %v1669_v62 = vld [vmem:[#allocation2 + $0x70] sm:$0xff]  }
  0x69   :  { %v1659_v59 = vld [vmem:[#allocation2 + $0x20] sm:$0xff]   ;;  %v1660_v61 = vld [vmem:[#allocation2 + $0x28] sm:$0xff]   ;;  %v1661_v63 = vld [vmem:[#allocation2 + $0x30] sm:$0xff]  }
  0x6a   :  { %2125 = vmatpush1.bf16.msra.mxu0 %v2124_v29  ;;  %2153 = vmatpush3.bf16.msra.mxu1 %v1657_v43  ;;  %v1670_v1 = vld [vmem:[#allocation2 + $0x78] sm:$0xff]   ;;  %v491_v41 = vld [vmem:[#allocation4 + $0x50] sm:$0xff]  ;;  %v494_v46 = vld [vmem:[#allocation4 + $0x68] sm:$0xff] }
  0x6b   :  { %2127 = vmatprep.subr.bf16.mxu0 %v2126_v30  ;;  %2155 = vmatprep.subr.bf16.mxu1 %v1666_v56  ;;  %v1662_v2 = vld [vmem:[#allocation2 + $0x38] sm:$0xff]   ;;  %v497_v47 = vld [vmem:[#allocation4 + $0x80] sm:$0xff]  ;;  %v503_v53 = vld [vmem:[#allocation4 + $0xb0] sm:$0xff] }
  0x6c   :  { %v484_v39 = vld [vmem:[#allocation4 + $0x18] sm:$0xff]  ;;  %v2214_v49 = vpack.c.bf16 %v497_v47, %v494_v46  ;;  %v547_v46 = vld [vmem:[#allocation4 + $0x210] sm:$0xff]  ;;  %v550_v47 = vld [vmem:[#allocation4 + $0x228] sm:$0xff] }
  0x6d   :  { %v488_v40 = vld [vmem:[#allocation4 + $0x38] sm:$0xff] }
  0x6e   :  { %2129 = vmatpush1.bf16.msra.mxu0 %v2128_v37  ;;  %2157 = vmatpush3.bf16.msra.mxu1 %v1658_v57  ;;  %v481_v37 = vld [vmem:[#allocation4] sm:$0xff]  ;;  %v500_v52 = vld [vmem:[#allocation4 + $0x98] sm:$0xff] }
  0x6f   :  { %2131 = vmatprep.subr.bf16.mxu0 %v2130_v38  ;;  %2159 = vmatprep.subr.bf16.mxu1 %v1667_v58  ;;  %v2208_v42 = vpack.c.bf16 %v484_v39, %v481_v37  ;;  %v545_v37 = vld [vmem:[#allocation4 + $0x200] sm:$0xff] }
  0x72   :  { %2133 = vmatpush1.bf16.msra.mxu0 %v2132_v44  ;;  %2161 = vmatpush3.bf16.msra.mxu1 %v1659_v59  ;;  %v487_v44 = vld [vmem:[#allocation4 + $0x30] sm:$0xff] }
  0x73   :  { %2135 = vmatprep.subr.bf16.mxu0 %v2134_v45  ;;  %2163 = vmatprep.subr.bf16.mxu1 %v1668_v60  ;;  %v490_v45 = vld [vmem:[#allocation4 + $0x48] sm:$0xff] }
  0x74   :  { %v2212_v48 = vpack.c.bf16 %v490_v45, %v487_v44 }
  0x76   :  { %2137 = vmatpush1.bf16.msra.mxu0 %v2136_v50  ;;  %2165 = vmatpush3.bf16.msra.mxu1 %v1660_v61  ;;  %v493_v50 = vld [vmem:[#allocation4 + $0x60] sm:$0xff] }
  0x77   :  { %2139 = vmatprep.subr.bf16.mxu0 %v2138_v51  ;;  %2167 = vmatprep.subr.bf16.mxu1 %v1669_v62  ;;  %v496_v51 = vld [vmem:[#allocation4 + $0x78] sm:$0xff] }
  0x7a   :  { %2141 = vmatpush1.bf16.msra.mxu0 %v2140_v54  ;;  %2169 = vmatpush3.bf16.msra.mxu1 %v1661_v63  ;;  %v2216_v54 = vpack.c.bf16 %v496_v51, %v493_v50  ;;  %v2252_v50 = vpack.c.bf16 %v550_v47, %v547_v46  ;;  %v513_v46 = vld [vmem:[#allocation4 + $0x100] sm:$0xff] }
  0x7b   :  { %2175 = vmatprep.subr.bf16.mxu0 %v1663_v26  ;;  %2171 = vmatprep.subr.bf16.mxu1 %v1670_v1 }
  0x7d   :  { %196 = vmatmul.mubr.f32.vlgmr.msra.gmra.mrb[0].mxu0 %v97_v55  ;;  %v2218_v55 = vpack.c.bf16 %v503_v53, %v500_v52  ;;  %v553_v52 = vld [vmem:[#allocation4 + $0x240] sm:$0xff]  ;;  %v556_v53 = vld [vmem:[#allocation4 + $0x258] sm:$0xff] }
  0x7e   :  { %2173 = vmatpush3.bf16.msra.mxu1 %v1662_v2 }
  0x83   :  { %2177 = vmatpush3.bf16.xpose.msra.mxu0 %v1497_v27 }
  0x84   :  { %2179 = vmatprep.subr.bf16.mxu0 %v1664_v28 }
  0x8b   :  { %2181 = vmatpush3.bf16.xpose.msra.mxu0 %v1656_v35  ;;  %v482_v35 = vld [vmem:[#allocation4 + $0x8] sm:$0xff] }
  0x8c   :  { %2183 = vmatprep.subr.bf16.mxu0 %v1665_v36  ;;  %v485_v36 = vld [vmem:[#allocation4 + $0x20] sm:$0xff] }
  0x8d   :  { %v2206_v38 = vpack.c.bf16 %v485_v36, %v482_v35  ;;  %v538_v35 = vld [vmem:[#allocation4 + $0x1c8] sm:$0xff] }
  0x8e   :  { %v542_v36 = vld [vmem:[#allocation4 + $0x1e8] sm:$0xff] }
  0x8f   :  { %2207 = vmatprep.subr.bf16.mxu1 %v2206_v38  ;;  %v2246_v39 = vpack.c.bf16 %v545_v37, %v542_v36 }
  0x93   :  { %2185 = vmatpush3.bf16.xpose.msra.mxu0 %v1657_v43  ;;  %v2210_v43 = vpack.c.bf16 %v491_v41, %v488_v40  ;;  %v541_v40 = vld [vmem:[#allocation4 + $0x1e0] sm:$0xff]  ;;  %v544_v41 = vld [vmem:[#allocation4 + $0x1f8] sm:$0xff] }
  0x94   :  { %2187 = vmatprep.subr.bf16.mxu0 %v1666_v56  ;;  %v499_v56 = vld [vmem:[#allocation4 + $0x90] sm:$0xff]  ;;  %v2248_v44 = vpack.c.bf16 %v544_v41, %v541_v40  ;;  %v561_v40 = vld [vmem:[#allocation4 + $0x280] sm:$0xff]  ;;  %v564_v41 = vld [vmem:[#allocation4 + $0x298] sm:$0xff] }
  0x9b   :  { %2189 = vmatpush3.bf16.xpose.msra.mxu0 %v1658_v57  ;;  %v502_v57 = vld [vmem:[#allocation4 + $0xa8] sm:$0xff] }
  0x9c   :  { %2191 = vmatprep.subr.bf16.mxu0 %v1667_v58  ;;  %v506_v58 = vld [vmem:[#allocation4 + $0xc8] sm:$0xff] }
  0xa3   :  { %2193 = vmatpush3.bf16.xpose.msra.mxu0 %v1659_v59  ;;  %v509_v59 = vld [vmem:[#allocation4 + $0xe0] sm:$0xff] }
  0xa4   :  { %2195 = vmatprep.subr.bf16.mxu0 %v1668_v60  ;;  %v531_v60 = vld [vmem:[#allocation4 + $0x190] sm:$0xff] }
  0xab   :  { %2197 = vmatpush3.bf16.xpose.msra.mxu0 %v1660_v61  ;;  %v534_v61 = vld [vmem:[#allocation4 + $0x1a8] sm:$0xff] }
  0xac   :  { %2199 = vmatprep.subr.bf16.mxu0 %v1669_v62  ;;  %v2220_v62 = vpack.c.bf16 %v502_v57, %v499_v56  ;;  %v2256_v56 = vpack.c.bf16 %v556_v53, %v553_v52  ;;  %v567_v52 = vld [vmem:[#allocation4 + $0x2b0] sm:$0xff] }
  0xb3   :  { %2201 = vmatpush3.bf16.xpose.msra.mxu0 %v1661_v63  ;;  %v2270_v63 = vpack.c.bf16 %v534_v61, %v531_v60 }
  0xb4   :  { %2203 = vmatprep.subr.bf16.mxu0 %v1670_v1  ;;  %v2222_v1 = vpack.c.bf16 %v509_v59, %v506_v58 }
  0xbb   :  { %2205 = vmatpush3.bf16.xpose.msra.mxu0 %v1662_v2  ;;  %v505_v2 = vld [vmem:[#allocation4 + $0xc0] sm:$0xff] }
  0xbc   :  { %2271 = vmatprep.subr.bf16.mxu0 %v2270_v63 }
 0x150   :  { %v2857_v3 = vpop.f32.mrb[0].mxu0 }
 0x151   :  { %v266_v4 = vrot.slane %v2857_v3, 4  ;;  %v278_v5 = vmul.f32 %v2857_v3, %v2857_v3  ;;  %v2862_v6 = vpop.f32.mrb[1].mxu0 }
 0x152   :  { %v272_v7 = vrot.slane %v2862_v6, 4  ;;  %v279_v8 = vmul.f32 %v2862_v6, %v2862_v6 }
 0x153   :  { %v267_v9 = vadd.f32 %v266_v4, %v2857_v3  ;;  %v280_v10 = vrot.slane %v278_v5, 4  ;;  %v508_v4 = vld [vmem:[#allocation4 + $0xd8] sm:$0xff] }
 0x154   :  { %v273_v11 = vadd.f32 %v272_v7, %v2862_v6  ;;  %v286_v12 = vrot.slane %v279_v8, 4  ;;  %v515_v7 = vld [vmem:[#allocation4 + $0x110] sm:$0xff] }
 0x155   :  { %v268_v13 = vrot.slane %v267_v9, 2  ;;  %v281_v14 = vadd.f32 %v280_v10, %v278_v5  ;;  %v512_v5 = vld [vmem:[#allocation4 + $0xf8] sm:$0xff]  ;;  %v511_v10 = vld [vmem:[#allocation4 + $0xf0] sm:$0xff] }
 0x156   :  { %v274_v15 = vrot.slane %v273_v11, 2  ;;  %v287_v16 = vadd.f32 %v286_v12, %v279_v8  ;;  %v2224_v8 = vpack.c.bf16 %v508_v4, %v505_v2  ;;  %v518_v12 = vld [vmem:[#allocation4 + $0x128] sm:$0xff]  ;;  %v2874_v4 = vld [vmem:[%s3076_s7] sm:$0xff] }
 0x157   :  { %v269_v17 = vadd.f32 %v268_v13, %v267_v9  ;;  %v282_v18 = vrot.slane %v281_v14, 2  ;;  %v2226_v9 = vpack.c.bf16 %v515_v7, %v512_v5  ;;  %v521_v13 = vld [vmem:[#allocation4 + $0x140] sm:$0xff]  ;;  %v376_v5 = vrot.slane %v2874_v4, 7 }
 0x158   :  { %v275_v19 = vadd.f32 %v274_v15, %v273_v11  ;;  %v288_v20 = vrot.slane %v287_v16, 2  ;;  %v514_v11 = vld [vmem:[#allocation4 + $0x108] sm:$0xff]  ;;  %v2230_v15 = vpack.c.bf16 %v521_v13, %v518_v12  ;;  %v483_v12 = vld [vmem:[#allocation4 + $0x10] sm:$0xff] }
 0x159   :  { %v270_v21 = vrot.slane %v269_v17, 1  ;;  %v283_v22 = vadd.f32 %v282_v18, %v281_v14  ;;  %v2228_v14 = vpack.c.bf16 %v514_v11, %v511_v10  ;;  %v524_v18 = vld [vmem:[#allocation4 + $0x158] sm:$0xff]  ;;  %v486_v13 = vld [vmem:[#allocation4 + $0x28] sm:$0xff] }
 0x15a   :  { %v276_v23 = vrot.slane %v275_v19, 1  ;;  %v289_v24 = vadd.f32 %v288_v20, %v287_v16  ;;  %v517_v16 = vld [vmem:[#allocation4 + $0x120] sm:$0xff] }
 0x15b   :  { %v284_v25 = vrot.slane %v283_v22, 1  ;;  %v271_v27 = vadd.f32 %v270_v21, %v269_v17  ;;  %v520_v17 = vld [vmem:[#allocation4 + $0x138] sm:$0xff] }
 0x15c   :  { %v290_v26 = vrot.slane %v289_v24, 1  ;;  %v277_v29 = vadd.f32 %v276_v23, %v275_v19  ;;  %v527_v19 = vld [vmem:[#allocation4 + $0x170] sm:$0xff]  ;;  %v2232_v20 = vpack.c.bf16 %v520_v17, %v517_v16  ;;  %v526_v23 = vld [vmem:[#allocation4 + $0x168] sm:$0xff]  ;;  %v2272_v17 = vpack.c.bf16 %v486_v13, %v483_v12  ;;  %v528_v12 = vld [vmem:[#allocation4 + $0x178] sm:$0xff] }
 0x15d   :  { %v285_v28 = vadd.f32 %v284_v25, %v283_v22  ;;  %v2234_v21 = vpack.c.bf16 %v527_v19, %v524_v18  ;;  %v523_v22 = vld [vmem:[#allocation4 + $0x150] sm:$0xff]  ;;  %v533_v25 = vld [vmem:[#allocation4 + $0x1a0] sm:$0xff] }
 0x15e   :  { %v291_v30 = vadd.f32 %v290_v26, %v289_v24  ;;  %v530_v24 = vld [vmem:[#allocation4 + $0x188] sm:$0xff]  ;;  %v2236_v26 = vpack.c.bf16 %v526_v23, %v523_v22  ;;  %v543_v22 = vld [vmem:[#allocation4 + $0x1f0] sm:$0xff] }
 0x15f   :  { %v293_v31 = vsel %vm292_vm0, %v271_v27, %v285_v28  ;;  %v2238_v27 = vpack.c.bf16 %v533_v25, %v530_v24  ;;  %v529_v28 = vld [vmem:[#allocation4 + $0x180] sm:$0xff]  ;;  %v546_v23 = vld [vmem:[#allocation4 + $0x208] sm:$0xff] }
 0x160   :  { %v294_v32 = vsel %vm292_vm0, %v277_v29, %v291_v30  ;;  %v295_v34 = vmul.f32 0.013888889, %v293_v31  ;;  %v532_v29 = vld [vmem:[#allocation4 + $0x198] sm:$0xff]  ;;  %v539_v31 = vld [vmem:[#allocation4 + $0x1d0] sm:$0xff]  ;;  %v2278_v25 = vpack.c.bf16 %v546_v23, %v543_v22 }
 0x161   :  { %v296_v33 = vmul.f32 0.013888889, %v294_v32  ;;  %v536_v30 = vld [vmem:[#allocation4 + $0x1b8] sm:$0xff]  ;;  %v2240_v32 = vpack.c.bf16 %v532_v29, %v529_v28  ;;  %v549_v28 = vld [vmem:[#allocation4 + $0x220] sm:$0xff] }
 0x162   :  { %v552_v29 = vld [vmem:[#allocation4 + $0x238] sm:$0xff] }
 0x163   :  { %361 = vmatprep.mubr.f32.mxu1 %v296_v33  ;;  %v2242_v33 = vpack.c.bf16 %v539_v31, %v536_v30  ;;  %v2282_v31 = vpack.c.bf16 %v552_v29, %v549_v28 }
 0x164   :  { %362 = vmatmul.mubr.f32.vlgmr.msra.gmra.mrb[0].mxu1 %v295_v34  ;;  %v535_v34 = vld [vmem:[#allocation4 + $0x1b0] sm:$0xff] }
 0x165   :  { %2209 = vmatpush1.bf16.msra.mxu1 %v2208_v42  ;;  %v2244_v38 = vpack.c.bf16 %v538_v35, %v535_v34  ;;  %v548_v42 = vld [vmem:[#allocation4 + $0x218] sm:$0xff]  ;;  %v555_v34 = vld [vmem:[#allocation4 + $0x250] sm:$0xff]  ;;  %v558_v35 = vld [vmem:[#allocation4 + $0x268] sm:$0xff] }
 0x166   :  { %2211 = vmatprep.subr.bf16.mxu1 %v2210_v43  ;;  %v551_v43 = vld [vmem:[#allocation4 + $0x230] sm:$0xff]  ;;  %v2286_v37 = vpack.c.bf16 %v558_v35, %v555_v34  ;;  %v2901_v34 = vld [vmem:[#allocation6 + $0x48] sm:$0xff]  }
 0x167   :  { %v2250_v45 = vpack.c.bf16 %v551_v43, %v548_v42  ;;  %v2290_v43 = vpack.c.bf16 %v564_v41, %v561_v40  ;;  %v2911_v35 = vld [vmem:[#allocation6 + $0x50] sm:$0xff]   ;;  %v2930_v40 = vld [vmem:[#allocation6 + $0x98] sm:$0xff]   ;;  %v2933_v41 = vld [vmem:[#allocation6 + $0x60] sm:$0xff]  }
 0x169   :  { %2213 = vmatpush1.bf16.msra.mxu1 %v2212_v48  ;;  %v554_v48 = vld [vmem:[#allocation4 + $0x248] sm:$0xff] }
 0x16a   :  { %2215 = vmatprep.subr.bf16.mxu1 %v2214_v49  ;;  %v557_v49 = vld [vmem:[#allocation4 + $0x260] sm:$0xff] }
 0x16b   :  { %v2254_v51 = vpack.c.bf16 %v557_v49, %v554_v48  ;;  %v516_v48 = vld [vmem:[#allocation4 + $0x118] sm:$0xff] }
 0x16c   :  { %v2292_v49 = vpack.c.bf16 %v516_v48, %v513_v46  ;;  %v2950_v46 = vld [vmem:[#allocation6 + $0xa8] sm:$0xff]   ;;  %v2957_v48 = vld [vmem:[#allocation6 + $0x30] sm:$0xff]  }
 0x16d   :  { %2217 = vmatpush1.bf16.msra.mxu1 %v2216_v54  ;;  %v560_v54 = vld [vmem:[#allocation4 + $0x278] sm:$0xff] }
 0x16e   :  { %2219 = vmatprep.subr.bf16.mxu1 %v2218_v55  ;;  %v563_v55 = vld [vmem:[#allocation4 + $0x290] sm:$0xff] }
 0x16f   :  { %v2258_v57 = vpack.c.bf16 %v563_v55, %v560_v54  ;;  %v570_v54 = vld [vmem:[#allocation4 + $0x2c8] sm:$0xff]  ;;  %v565_v55 = vld [vmem:[#allocation4 + $0x2a0] sm:$0xff] }
 0x171   :  { %2221 = vmatpush1.bf16.msra.mxu1 %v2220_v62 }
 0x172   :  { %2223 = vmatprep.subr.bf16.mxu1 %v2222_v1 }
 0x175   :  { %2225 = vmatpush1.bf16.msra.mxu1 %v2224_v8 }
 0x176   :  { %2227 = vmatprep.subr.bf16.mxu1 %v2226_v9 }
 0x179   :  { %2229 = vmatpush1.bf16.msra.mxu1 %v2228_v14  ;;  %v537_v14 = vld [vmem:[#allocation4 + $0x1c0] sm:$0xff] }
 0x17a   :  { %2231 = vmatprep.subr.bf16.mxu1 %v2230_v15  ;;  %v540_v15 = vld [vmem:[#allocation4 + $0x1d8] sm:$0xff] }
 0x17b   :  { %v2274_v19 = vpack.c.bf16 %v540_v15, %v537_v14  ;;  %v2879_v14 = vld [vmem:[#allocation6 + $0x40] sm:$0xff]   ;;  %v2644_v15 = vmov 0.0|0.0  }
 0x17d   :  { %2233 = vmatpush1.bf16.msra.mxu1 %v2232_v20  ;;  %v489_v20 = vld [vmem:[#allocation4 + $0x40] sm:$0xff] }
 0x17e   :  { %2235 = vmatprep.subr.bf16.mxu1 %v2234_v21  ;;  %v492_v21 = vld [vmem:[#allocation4 + $0x58] sm:$0xff] }
 0x17f   :  { %v2276_v24 = vpack.c.bf16 %v492_v21, %v489_v20 }
 0x181   :  { %2237 = vmatpush1.bf16.msra.mxu1 %v2236_v26  ;;  %v495_v26 = vld [vmem:[#allocation4 + $0x70] sm:$0xff] }
 0x182   :  { %2239 = vmatprep.subr.bf16.mxu1 %v2238_v27  ;;  %v498_v27 = vld [vmem:[#allocation4 + $0x88] sm:$0xff] }
 0x183   :  { %v2280_v30 = vpack.c.bf16 %v498_v27, %v495_v26 }
 0x185   :  { %2241 = vmatpush1.bf16.msra.mxu1 %v2240_v32  ;;  %v501_v32 = vld [vmem:[#allocation4 + $0xa0] sm:$0xff] }
 0x186   :  { %2243 = vmatprep.subr.bf16.mxu1 %v2242_v33  ;;  %v504_v33 = vld [vmem:[#allocation4 + $0xb8] sm:$0xff] }
 0x187   :  { %v2284_v36 = vpack.c.bf16 %v504_v33, %v501_v32  ;;  %v2897_v32 = vld [vmem:[#allocation6] sm:$0xff]  }
 0x188   :  { %v2899_v33 = vld [vmem:[#allocation6 + $0x80] sm:$0xff]  }
 0x189   :  { %2245 = vmatpush1.bf16.msra.mxu1 %v2244_v38  ;;  %v507_v38 = vld [vmem:[#allocation4 + $0xd0] sm:$0xff] }
 0x18a   :  { %2247 = vmatprep.subr.bf16.mxu1 %v2246_v39  ;;  %v510_v39 = vld [vmem:[#allocation4 + $0xe8] sm:$0xff] }
 0x18b   :  { %v2288_v42 = vpack.c.bf16 %v510_v39, %v507_v38  ;;  %v2924_v38 = vld [vmem:[#allocation6 + $0x58] sm:$0xff]  }
 0x18c   :  { %v2927_v39 = vld [vmem:[#allocation6 + $0x18] sm:$0xff]  }
 0x18d   :  { %2249 = vmatpush1.bf16.msra.mxu1 %v2248_v44  ;;  %v559_v44 = vld [vmem:[#allocation4 + $0x270] sm:$0xff] }
 0x18e   :  { %2251 = vmatprep.subr.bf16.mxu1 %v2250_v45  ;;  %v562_v45 = vld [vmem:[#allocation4 + $0x288] sm:$0xff] }
 0x18f   :  { %v2260_v47 = vpack.c.bf16 %v562_v45, %v559_v44  ;;  %v2943_v44 = vld [vmem:[#allocation6 + $0x68] sm:$0xff]  }
 0x190   :  { %v2947_v45 = vld [vmem:[#allocation6 + $0x28] sm:$0xff]  }
 0x191   :  { %2253 = vmatpush1.bf16.msra.mxu1 %v2252_v50  ;;  %v566_v50 = vld [vmem:[#allocation4 + $0x2a8] sm:$0xff] }
 0x192   :  { %2255 = vmatprep.subr.bf16.mxu1 %v2254_v51  ;;  %v569_v51 = vld [vmem:[#allocation4 + $0x2c0] sm:$0xff] }
 0x193   :  { %v2262_v53 = vpack.c.bf16 %v569_v51, %v566_v50  ;;  %v2962_v50 = vld [vmem:[#allocation6 + $0x78] sm:$0xff]  }
 0x194   :  { %v2966_v51 = vld [vmem:[#allocation6 + $0x38] sm:$0xff]  }
 0x195   :  { %2257 = vmatpush1.bf16.msra.mxu1 %v2256_v56  ;;  %v568_v56 = vld [vmem:[#allocation4 + $0x2b8] sm:$0xff] }
 0x196   :  { %2259 = vmatprep.subr.bf16.mxu1 %v2258_v57  ;;  %v2294_v57 = vpack.c.bf16 %v570_v54, %v567_v52  ;;  %v2969_v52 = vld [vmem:[#allocation6 + $0xb8] sm:$0xff]  }
 0x199   :  { %2261 = vmatpush1.bf16.msra.mxu1 %v2260_v47  ;;  %v2953_v47 = vld [vmem:[#allocation6 + $0x70] sm:$0xff]  }
 0x19a   :  { %2263 = vmatprep.subr.bf16.mxu1 %v2262_v53 }
 0x237   :  { %v1726_v58 = vpop.f32.mrb[0].mxu1 }
 0x238   :  { %v1727_v59 = vpop.f32.mrb[1].mxu1 }
 0x239   :  { %v1728_v60 = vadd.f32 %v1727_v59, %v1726_v58  ;;  %v2264_v58 = vpack.c.bf16 %v568_v56, %v565_v55  ;;  %v519_v59 = vld [vmem:[#allocation4 + $0x130] sm:$0xff] }
 0x23b   :  { %v367_v61 = vmul.f32 %v1728_v60, %v1728_v60  ;;  %2265 = vmatpush1.bf16.msra.mxu1 %v2264_v58 }
 0x23d   :  { %v369_v62 = vrot.slane %v367_v61, 7 }
 0x23f   :  { %v371_v63 = vsub.f32 %v1728_v60, %v369_v62  ;;  %v572_v62 = vld [vmem:[#allocation4 + $0x2d8] sm:$0xff] }
 0x241   :  { %v372_v1 = vmax.f32 %v371_v63, 0.0  ;;  %v575_v63 = vld [vmem:[#allocation4 + $0x2f0] sm:$0xff] }
 0x243   :  { %v373_v2 = vadd.f32 1e-05, %v372_v1  ;;  %v573_v1 = vld [vmem:[#allocation4 + $0x2e0] sm:$0xff] }
 0x245   :  { %2508 = vrsqrt.f32 %v373_v2  ;;  %v2266_v2 = vpack.c.bf16 %v575_v63, %v572_v62 }
 0x247   :  { %2267 = vmatprep.subr.bf16.mxu1 %v2266_v2 }
 0x24f   :  { %v2509_v7 = vpop.eup %2508 }
 0x250   :  { %v378_v8 = vmul.f32 %v2509_v7, %v376_v5  ;;  %v576_v5 = vld [vmem:[#allocation4 + $0x2f8] sm:$0xff]  ;;  %v571_v7 = vld [vmem:[#allocation4 + $0x2d0] sm:$0xff] }
 0x252   :  { %v380_v9 = vrot.slane %v378_v8, 1  ;;  %v574_v8 = vld [vmem:[#allocation4 + $0x2e8] sm:$0xff] }
 0x254   :  { %v382_v10 = vmul.f32 %v1728_v60, %v380_v9  ;;  %v522_v60 = vld [vmem:[#allocation4 + $0x148] sm:$0xff] }
 0x255   :  { %v2296_v61 = vpack.c.bf16 %v522_v60, %v519_v59 }
 0x256   :  { %v384_v11 = vrot.slane %v382_v10, 7  ;;  %v2268_v10 = vpack.c.bf16 %v574_v8, %v571_v7 }
 0x258   :  { %v386_v16 = vsub.f32 %v2874_v4, %v384_v11  ;;  %v525_v11 = vld [vmem:[#allocation4 + $0x160] sm:$0xff]  ;;  %2269 = vmatpush1.bf16.msra.mxu1 %v2268_v10 }
 0x259   :  { %v2300_v13 = vpack.c.bf16 %v528_v12, %v525_v11  ;;  %2303 = vmatprep.subr.bf16.mxu1 %v2879_v14 }
 0x25a   :  { %v387_v18 = vsel %vm292_vm0, %v380_v9, %v386_v16  ;;  %v2298_v9 = vpack.c.bf16 %v576_v5, %v573_v1  ;;  %v459_v16 = vlaneseq }
 0x25b   :  { %1761 = vmatprep.mubr.f32.mxu0 %v387_v18 }
 0x25c   :  { %1762 = vmatmul.mubr.f32.vlgmr.msra.gmra.mrb[2].mxu0 %v387_v18 }
 0x25d   :  { %2273 = vmatpush3.bf16.msra.mxu0 %v2272_v17  ;;  %v2883_v17 = vshrl.u32 %v459_v16, 7 }
 0x25e   :  { %2275 = vmatprep.subr.bf16.mxu0 %v2274_v19 }
 0x25f   :  { %v2886_v18 = vsub.s32 0, %v2883_v17  ;;  %v2889_v19 = vsub.s32 1, %v2883_v17 }
 0x261   :  { %2277 = vmatpush3.bf16.msra.mxu0 %v2276_v24 }
 0x262   :  { %2279 = vmatprep.subr.bf16.mxu0 %v2278_v25 }
 0x265   :  { %2281 = vmatpush3.bf16.msra.mxu0 %v2280_v30 }
 0x266   :  { %2283 = vmatprep.subr.bf16.mxu0 %v2282_v31 }
 0x269   :  { %2285 = vmatpush3.bf16.msra.mxu0 %v2284_v36  ;;  %v2916_v36 = vld [vmem:[#allocation6 + $0x10] sm:$0xff]  }
 0x26a   :  { %2287 = vmatprep.subr.bf16.mxu0 %v2286_v37  ;;  %v2919_v37 = vld [vmem:[#allocation6 + $0x90] sm:$0xff]  }
 0x26d   :  { %2289 = vmatpush3.bf16.msra.mxu0 %v2288_v42  ;;  %v2937_v42 = vld [vmem:[#allocation6 + $0x20] sm:$0xff]  }
 0x26e   :  { %2291 = vmatprep.subr.bf16.mxu0 %v2290_v43  ;;  %v2940_v43 = vld [vmem:[#allocation6 + $0xa0] sm:$0xff]  }
 0x271   :  { %2293 = vmatpush3.bf16.msra.mxu0 %v2292_v49  ;;  %v2960_v49 = vld [vmem:[#allocation6 + $0xb0] sm:$0xff]  }
 0x272   :  { %2295 = vmatprep.subr.bf16.mxu0 %v2294_v57 }
 0x275   :  { %2297 = vmatpush3.bf16.msra.mxu0 %v2296_v61 }
 0x276   :  { %2299 = vmatprep.subr.bf16.mxu0 %v2298_v9 }
 0x279   :  { %2301 = vmatpush3.bf16.msra.mxu0 %v2300_v13 }
 0x27a   :  { %2334 = vmatprep.subr.bf16.mxu0 %v2644_v15 }
 0x32f   :  { %v454_v20 = vpop.f32.mrb[2].mxu0 }
 0x330   :  { %v462_v21 = vrot.slane %v454_v20, %v2886_v18  ;;  %v456_v22 = vpop.f32.mrb[3].mxu0  ;;  %v472_v25 = vrot.slane %v454_v20, %v2889_v19 }
 0x331   :  { %v466_v23 = vrot.slane %v456_v22, %v2886_v18  ;;  %v476_v27 = vrot.slane %v456_v22, %v2889_v19 }
 0x332   :  { %v467_v24 = vmul.f32 %v462_v21, %v2857_v3  ;;  %v2906_v3 = vld [vmem:[#allocation6 + $0x8] sm:$0xff]  }
 0x333   :  { %v468_v26 = vmul.f32 %v466_v23, %v2862_v6  ;;  %v2909_v6 = vld [vmem:[#allocation6 + $0x88] sm:$0xff]  }
 0x334   :  { %v477_v28 = vadd.f32 %v472_v25, %v467_v24 }
 0x335   :  { %v478_v29 = vadd.f32 %v476_v27, %v468_v26 }
 0x336   :  { %v479_v31 = vmax.f32 %v477_v28, 0.0 }
 0x337   :  { %v480_v30 = vmax.f32 %v478_v29, 0.0 }
 0x339   :  { %641 = vmatprep.mubr.f32.mxu1 %v480_v30  ;;  %712 = vmatprep.mubr.f32.mxu0 %v480_v30 }
 0x33a   :  { %642 = vmatmul.mubr.f32.vlgmr.msra.gmra.mrb[2].mxu1 %v479_v31  ;;  %713 = vmatmul.mubr.f32.vlgmr.msra.gmra.mrb[4].mxu0 %v479_v31 }
 0x33b   :  { %2305 = vmatpush3.bf16.msra.mxu1 %v2897_v32  ;;  %2336 = vmatpush3.bf16.msra.mxu0 %v2899_v33 }
 0x33c   :  { %2307 = vmatprep.subr.bf16.mxu1 %v2901_v34  ;;  %2337 = vmatprep.subr.bf16.mxu0 %v2644_v15 }
 0x33d   :  { %2002 = vmatprep.mubr.msk.f32.mxu0 %vm2645_vm1, %v2643_v0 }
 0x33f   :  { %2309 = vmatpush3.bf16.msra.mxu1 %v2906_v3  ;;  %2339 = vmatpush3.bf16.msra.mxu0 %v2909_v6 }
 0x340   :  { %2311 = vmatprep.subr.bf16.mxu1 %v2911_v35  ;;  %2340 = vmatprep.subr.bf16.mxu0 %v2644_v15 }
 0x343   :  { %2313 = vmatpush3.bf16.msra.mxu1 %v2916_v36  ;;  %2342 = vmatpush3.bf16.msra.mxu0 %v2919_v37 }
 0x344   :  { %2343 = vmatprep.subr.bf16.mxu0 %v2644_v15  ;;  %2315 = vmatprep.subr.bf16.mxu1 %v2924_v38 }
 0x347   :  { %2317 = vmatpush3.bf16.msra.mxu1 %v2927_v39  ;;  %2345 = vmatpush3.bf16.msra.mxu0 %v2930_v40 }
 0x348   :  { %2346 = vmatprep.subr.bf16.mxu0 %v2644_v15  ;;  %2319 = vmatprep.subr.bf16.mxu1 %v2933_v41 }
 0x34b   :  { %2321 = vmatpush3.bf16.msra.mxu1 %v2937_v42  ;;  %2348 = vmatpush3.bf16.msra.mxu0 %v2940_v43 }
 0x34c   :  { %2349 = vmatprep.subr.bf16.mxu0 %v2644_v15  ;;  %2323 = vmatprep.subr.bf16.mxu1 %v2943_v44 }
 0x34f   :  { %2325 = vmatpush3.bf16.msra.mxu1 %v2947_v45  ;;  %2351 = vmatpush3.bf16.msra.mxu0 %v2950_v46 }
 0x350   :  { %2352 = vmatprep.subr.bf16.mxu0 %v2644_v15  ;;  %2327 = vmatprep.subr.bf16.mxu1 %v2953_v47 }
 0x353   :  { %2329 = vmatpush3.bf16.msra.mxu1 %v2957_v48  ;;  %2354 = vmatpush3.bf16.msra.mxu0 %v2960_v49 }
 0x354   :  { %2331 = vmatprep.subr.bf16.mxu1 %v2962_v50  ;;  %2355 = vmatprep.subr.bf16.mxu0 %v2644_v15 }
 0x357   :  { %2333 = vmatpush3.bf16.msra.mxu1 %v2966_v51  ;;  %2357 = vmatpush3.bf16.msra.mxu0 %v2969_v52 }
 0x358   :  { %2359 = vmatprep.subr.bf16.mxu1 %v2879_v14  ;;  %2390 = vmatprep.subr.bf16.mxu0 %v2644_v15 }
 0x40d   :  { %v2977_v53 = vpop.f32.mrb[2].mxu1  ;;  %v1795_v54 = vpop.f32.mrb[4].mxu0 }
 0x40e   :  { %v814_v55 = vrot.slane %v2977_v53, 4  ;;  %v832_v56 = vmul.f32 %v2977_v53, %v2977_v53  ;;  %v2982_v57 = vpop.f32.mrb[3].mxu1  ;;  %v1796_v58 = vpop.f32.mrb[5].mxu0 }
 0x40f   :  { %v820_v59 = vrot.slane %v2982_v57, 4  ;;  %v833_v60 = vmul.f32 %v2982_v57, %v2982_v57  ;;  %v2987_v61 = vadd.f32 %v1796_v58, %v1795_v54 }
 0x410   :  { %v815_v62 = vadd.f32 %v814_v55, %v2977_v53  ;;  %v835_v63 = vrot.slane %v832_v56, 4 }
 0x411   :  { %v821_v1 = vadd.f32 %v820_v59, %v2982_v57  ;;  %v841_v2 = vrot.slane %v833_v60, 4  ;;  %v826_v5 = vrot.slane %v2987_v61, 4  ;;  %v834_v7 = vmul.f32 %v2987_v61, %v2987_v61 }
 0x412   :  { %v816_v8 = vrot.slane %v815_v62, 2  ;;  %v836_v9 = vadd.f32 %v835_v63, %v832_v56 }
 0x413   :  { %v822_v10 = vrot.slane %v821_v1, 2  ;;  %v842_v11 = vadd.f32 %v841_v2, %v833_v60  ;;  %v827_v12 = vadd.f32 %v2987_v61, %v826_v5  ;;  %v847_v13 = vrot.slane %v834_v7, 4 }
 0x414   :  { %v817_v14 = vadd.f32 %v816_v8, %v815_v62  ;;  %v837_v16 = vrot.slane %v836_v9, 2 }
 0x415   :  { %v823_v20 = vadd.f32 %v822_v10, %v821_v1  ;;  %v843_v21 = vrot.slane %v842_v11, 2  ;;  %v828_v22 = vrot.slane %v827_v12, 2  ;;  %v848_v23 = vadd.f32 %v847_v13, %v834_v7  ;;  %v1214_v13 = vld [vmem:[#allocation7 + $0x90] sm:$0xff] }
 0x416   :  { %v818_v24 = vrot.slane %v817_v14, 1  ;;  %v838_v25 = vadd.f32 %v837_v16, %v836_v9 }
 0x417   :  { %v824_v26 = vrot.slane %v823_v20, 1  ;;  %v844_v27 = vadd.f32 %v843_v21, %v842_v11  ;;  %v829_v28 = vadd.f32 %v828_v22, %v827_v12  ;;  %v849_v29 = vrot.slane %v848_v23, 2  ;;  %v1196_v11 = vld [vmem:[#allocation7] sm:$0xff]  ;;  %v1197_v12 = vld [vmem:[#allocation7 + $0x8] sm:$0xff]  ;;  %v1230_v22 = vld [vmem:[#allocation7 + $0x110] sm:$0xff] }
 0x418   :  { %v839_v30 = vrot.slane %v838_v25, 1  ;;  %v819_v56 = vadd.f32 %v818_v24, %v817_v14  ;;  %v1215_v14 = vld [vmem:[#allocation7 + $0x98] sm:$0xff]  ;;  %v2416_v21 = vpack.c.bf16 %v1197_v12, %v1196_v11  ;;  %v1225_v11 = vld [vmem:[#allocation7 + $0xe8] sm:$0xff] }
 0x419   :  { %v830_v31 = vrot.slane %v829_v28, 1  ;;  %v850_v54 = vadd.f32 %v849_v29, %v848_v23  ;;  %v845_v55 = vrot.slane %v844_v27, 1  ;;  %v825_v59 = vadd.f32 %v824_v26, %v823_v20  ;;  %v1231_v23 = vld [vmem:[#allocation7 + $0x118] sm:$0xff]  ;;  %v1198_v26 = vld [vmem:[#allocation7 + $0x10] sm:$0xff]  ;;  %v1217_v29 = vld [vmem:[#allocation7 + $0xa8] sm:$0xff] }
 0x41a   :  { %v840_v58 = vadd.f32 %v839_v30, %v838_v25  ;;  %v2418_v25 = vpack.c.bf16 %v1215_v14, %v1214_v13  ;;  %v2450_v30 = vpack.c.bf16 %v1231_v23, %v1230_v22  ;;  %v1208_v13 = vld [vmem:[#allocation7 + $0x60] sm:$0xff]  ;;  %v1209_v14 = vld [vmem:[#allocation7 + $0x68] sm:$0xff]  ;;  %v1226_v23 = vld [vmem:[#allocation7 + $0xf0] sm:$0xff] }
 0x41b   :  { %v846_v60 = vadd.f32 %v845_v55, %v844_v27  ;;  %v851_v62 = vrot.slane %v850_v54, 1  ;;  %v831_v2 = vadd.f32 %v830_v31, %v829_v28  ;;  %v1199_v27 = vld [vmem:[#allocation7 + $0x18] sm:$0xff]  ;;  %v1216_v28 = vld [vmem:[#allocation7 + $0xa0] sm:$0xff]  ;;  %v1233_v55 = vld [vmem:[#allocation7 + $0x128] sm:$0xff] }
 0x41c   :  { %v853_v63 = vsel %vm292_vm0, %v819_v56, %v840_v58  ;;  %v2420_v31 = vpack.c.bf16 %v1199_v27, %v1198_v26  ;;  %v2422_v56 = vpack.c.bf16 %v1217_v29, %v1216_v28  ;;  %v1200_v58 = vld [vmem:[#allocation7 + $0x20] sm:$0xff]  ;;  %v1210_v26 = vld [vmem:[#allocation7 + $0x70] sm:$0xff]  ;;  %v1211_v27 = vld [vmem:[#allocation7 + $0x78] sm:$0xff] }
 0x41d   :  { %v854_v1 = vsel %vm292_vm0, %v825_v59, %v846_v60  ;;  %v852_v5 = vadd.f32 %v851_v62, %v850_v54  ;;  %v856_v8 = vmul.f32 0.013888889, %v853_v63  ;;  %v1232_v54 = vld [vmem:[#allocation7 + $0x120] sm:$0xff]  ;;  %v1201_v59 = vld [vmem:[#allocation7 + $0x28] sm:$0xff]  ;;  %v1218_v60 = vld [vmem:[#allocation7 + $0xb0] sm:$0xff]  ;;  %v2444_v28 = vpack.c.bf16 %v1211_v27, %v1210_v26 }
 0x41e   :  { %v857_v7 = vmul.f32 0.013888889, %v854_v1  ;;  %v1219_v62 = vld [vmem:[#allocation7 + $0xb8] sm:$0xff]  ;;  %v2453_v63 = vpack.c.bf16 %v1233_v55, %v1232_v54  ;;  %v2424_v1 = vpack.c.bf16 %v1201_v59, %v1200_v58 }
 0x41f   :  { %v855_v9 = vsel %vm292_vm0, %v831_v2, %v852_v5  ;;  %v1234_v2 = vld [vmem:[#allocation7 + $0x130] sm:$0xff]  ;;  %v1235_v5 = vld [vmem:[#allocation7 + $0x138] sm:$0xff] }
 0x420   :  { %923 = vmatprep.mubr.f32.mxu1 %v857_v7  ;;  %v858_v10 = vmul.f32 0.013888889, %v855_v9  ;;  %v2426_v7 = vpack.c.bf16 %v1219_v62, %v1218_v60  ;;  %v1203_v9 = vld [vmem:[#allocation7 + $0x38] sm:$0xff] }
 0x421   :  { %924 = vmatmul.mubr.f32.vlgmr.msra.gmra.mrb[4].mxu1 %v856_v8  ;;  %v1202_v8 = vld [vmem:[#allocation7 + $0x30] sm:$0xff] }
 0x422   :  { %2003 = vmatmul.mubr.f32.vlgmr.msra.gmra.mrb[6].mxu0 %v858_v10  ;;  %2361 = vmatpush3.bf16.xpose.msra.mxu1 %v2897_v32  ;;  %v1212_v32 = vld [vmem:[#allocation7 + $0x80] sm:$0xff] }
 0x423   :  { %2392 = vmatpush3.bf16.xpose.msra.mxu0 %v2899_v33  ;;  %2363 = vmatprep.subr.bf16.mxu1 %v2901_v34  ;;  %v1213_v33 = vld [vmem:[#allocation7 + $0x88] sm:$0xff]  ;;  %v1220_v10 = vld [vmem:[#allocation7 + $0xc0] sm:$0xff] }
 0x424   :  { %2393 = vmatprep.subr.bf16.mxu0 %v2644_v15  ;;  %2037 = vmatprep.mubr.msk.f32.mxu0 %vm2645_vm1, %v2643_v0  ;;  %v2414_v34 = vpack.c.bf16 %v1213_v33, %v1212_v32  ;;  %v1221_v32 = vld [vmem:[#allocation7 + $0xc8] sm:$0xff]  ;;  %v2456_v33 = vpack.c.bf16 %v1235_v5, %v1234_v2 }
 0x42a   :  { %2365 = vmatpush3.bf16.xpose.msra.mxu1 %v2906_v3 }
 0x42b   :  { %2395 = vmatpush3.bf16.xpose.msra.mxu0 %v2909_v6  ;;  %2367 = vmatprep.subr.bf16.mxu1 %v2911_v35 }
 0x42c   :  { %2396 = vmatprep.subr.bf16.mxu0 %v2644_v15 }
 0x432   :  { %2369 = vmatpush3.bf16.xpose.msra.mxu1 %v2916_v36 }
 0x433   :  { %2398 = vmatpush3.bf16.xpose.msra.mxu0 %v2919_v37  ;;  %2371 = vmatprep.subr.bf16.mxu1 %v2924_v38 }
 0x434   :  { %2399 = vmatprep.subr.bf16.mxu0 %v2644_v15 }
 0x43a   :  { %2373 = vmatpush3.bf16.xpose.msra.mxu1 %v2927_v39 }
 0x43b   :  { %2401 = vmatpush3.bf16.xpose.msra.mxu0 %v2930_v40  ;;  %2375 = vmatprep.subr.bf16.mxu1 %v2933_v41 }
 0x43c   :  { %2402 = vmatprep.subr.bf16.mxu0 %v2644_v15 }
 0x442   :  { %2377 = vmatpush3.bf16.xpose.msra.mxu1 %v2937_v42 }
 0x443   :  { %2404 = vmatpush3.bf16.xpose.msra.mxu0 %v2940_v43  ;;  %2379 = vmatprep.subr.bf16.mxu1 %v2943_v44  ;;  %v1007_v44 = vrot.slane %v2874_v4, 1 }
 0x444   :  { %2405 = vmatprep.subr.bf16.mxu0 %v2644_v15 }
 0x44a   :  { %2381 = vmatpush3.bf16.xpose.msra.mxu1 %v2947_v45 }
 0x44b   :  { %2407 = vmatpush3.bf16.xpose.msra.mxu0 %v2950_v46  ;;  %2383 = vmatprep.subr.bf16.mxu1 %v2953_v47 }
 0x44c   :  { %2408 = vmatprep.subr.bf16.mxu0 %v2644_v15 }
 0x452   :  { %2385 = vmatpush3.bf16.xpose.msra.mxu1 %v2957_v48 }
 0x453   :  { %2410 = vmatpush3.bf16.xpose.msra.mxu0 %v2960_v49  ;;  %2387 = vmatprep.subr.bf16.mxu1 %v2962_v50  ;;  %v1228_v50 = vld [vmem:[#allocation7 + $0x100] sm:$0xff] }
 0x454   :  { %2411 = vmatprep.subr.bf16.mxu0 %v2644_v15 }
 0x45a   :  { %2389 = vmatpush3.bf16.xpose.msra.mxu1 %v2966_v51  ;;  %v1229_v51 = vld [vmem:[#allocation7 + $0x108] sm:$0xff] }
 0x45b   :  { %2413 = vmatpush3.bf16.xpose.msra.mxu0 %v2969_v52  ;;  %2415 = vmatprep.subr.bf16.mxu1 %v2414_v34  ;;  %v2447_v20 = vpack.c.bf16 %v1229_v51, %v1228_v50  ;;  %v2428_v34 = vpack.c.bf16 %v1203_v9, %v1202_v8  ;;  %v1241_v50 = vld [vmem:[#allocation7 + $0x168] sm:$0xff]  ;;  %v1389_v8 = vld [vmem:[#allocation9] sm:$0xff] }
 0x45c   :  { %2446 = vmatprep.subr.bf16.mxu0 %v2644_v15  ;;  %v1390_v9 = vld [vmem:[#allocation9 + $0x8] sm:$0xff] }
 0x4f4   :  { %v1830_v3 = vpop.f32.mrb[4].mxu1 }
 0x4f5   :  { %v1831_v6 = vpop.f32.mrb[5].mxu1  ;;  %v995_v35 = vpop.f32.mrb[6].mxu0 }
 0x4f6   :  { %v1832_v36 = vadd.f32 %v1831_v6, %v1830_v3  ;;  %v2004_v37 = vpop.f32.mrb[7].mxu0  ;;  %v1236_v3 = vld [vmem:[#allocation7 + $0x140] sm:$0xff]  ;;  %v1237_v6 = vld [vmem:[#allocation7 + $0x148] sm:$0xff] }
 0x4f7   :  { %v1205_v37 = vld [vmem:[#allocation7 + $0x48] sm:$0xff] }
 0x4f8   :  { %v996_v38 = vadd.f32 %v1832_v36, %v995_v35  ;;  %v2430_v35 = vpack.c.bf16 %v1221_v32, %v1220_v10  ;;  %v1204_v36 = vld [vmem:[#allocation7 + $0x40] sm:$0xff] }
 0x4fa   :  { %v999_v39 = vmul.f32 %v996_v38, %v996_v38 }
 0x4fc   :  { %v1001_v40 = vrot.slane %v999_v39, 7  ;;  %v2432_v39 = vpack.c.bf16 %v1205_v37, %v1204_v36  ;;  %v1396_v36 = vld [vmem:[#allocation9 + $0x38] sm:$0xff] }
 0x4fe   :  { %v1003_v41 = vsub.f32 %v996_v38, %v1001_v40  ;;  %v1238_v40 = vld [vmem:[#allocation7 + $0x150] sm:$0xff] }
 0x500   :  { %v1004_v42 = vmax.f32 %v1003_v41, 0.0  ;;  %v1239_v41 = vld [vmem:[#allocation7 + $0x158] sm:$0xff] }
 0x502   :  { %v1005_v43 = vadd.f32 1e-05, %v1004_v42  ;;  %v2462_v42 = vpack.c.bf16 %v1239_v41, %v1238_v40  ;;  %v1400_v41 = vld [vmem:[#allocation9 + $0x58] sm:$0xff] }
 0x504   :  { %2510 = vrsqrt.f32 %v1005_v43  ;;  %v1222_v43 = vld [vmem:[#allocation7 + $0xd0] sm:$0xff] }
 0x50e   :  { %v2511_v45 = vpop.eup %2510 }
 0x50f   :  { %v1009_v46 = vmul.f32 %v2511_v45, %v1007_v44  ;;  %v1223_v44 = vld [vmem:[#allocation7 + $0xd8] sm:$0xff] }
 0x510   :  { %v2434_v45 = vpack.c.bf16 %v1223_v44, %v1222_v43  ;;  %v1401_v43 = vld [vmem:[#allocation9 + $0x60] sm:$0xff]  ;;  %v1402_v44 = vld [vmem:[#allocation9 + $0x68] sm:$0xff] }
 0x511   :  { %v1011_v47 = vrot.slane %v1009_v46, 1  ;;  %v1206_v46 = vld [vmem:[#allocation7 + $0x50] sm:$0xff] }
 0x513   :  { %v1013_v48 = vmul.f32 %v1011_v47, %v996_v38  ;;  %v2459_v38 = vpack.c.bf16 %v1237_v6, %v1236_v3  ;;  %v1391_v3 = vld [vmem:[#allocation9 + $0x10] sm:$0xff] }
 0x515   :  { %v1015_v49 = vrot.slane %v1013_v48, 5 }
 0x517   :  { %v1017_v52 = vsub.f32 %v2874_v4, %v1015_v49  ;;  %v1240_v49 = vld [vmem:[#allocation7 + $0x160] sm:$0xff] }
 0x518   :  { %v2465_v51 = vpack.c.bf16 %v1241_v50, %v1240_v49  ;;  %v1246_v49 = vsub.s32 4, %v2883_v17 }
 0x519   :  { %v1019_v16 = vrot.slane %v1017_v52, 2  ;;  %v1224_v52 = vld [vmem:[#allocation7 + $0xe0] sm:$0xff] }
 0x51a   :  { %v2438_v12 = vpack.c.bf16 %v1225_v11, %v1224_v52  ;;  %v1247_v11 = vrot.slane %v2874_v4, %v1246_v49 }
 0x51b   :  { %v1021_v24 = vsel %vm292_vm0, %v1011_v47, %v1019_v16  ;;  %v1207_v47 = vld [vmem:[#allocation7 + $0x58] sm:$0xff]  ;;  %v2440_v16 = vpack.c.bf16 %v1209_v14, %v1208_v13 }
 0x51c   :  { %1882 = vmatprep.mubr.f32.mxu1 %v1021_v24  ;;  %2038 = vmatmul.mubr.f32.vlgmr.msra.gmra.mrb[8].mxu0 %v1021_v24  ;;  %v2436_v48 = vpack.c.bf16 %v1207_v47, %v1206_v46  ;;  %v1403_v46 = vld [vmem:[#allocation9 + $0x70] sm:$0xff]  ;;  %v1404_v47 = vld [vmem:[#allocation9 + $0x78] sm:$0xff] }
 0x51d   :  { %1883 = vmatmul.mubr.f32.vlgmr.msra.gmra.mrb[6].mxu1 %v1021_v24  ;;  %2448 = vmatpush3.bf16.msra.mxu0 %v2447_v20  ;;  %v1242_v20 = vld [vmem:[#allocation7 + $0x170] sm:$0xff]  ;;  %v1227_v24 = vld [vmem:[#allocation7 + $0xf8] sm:$0xff] }
 0x51e   :  { %2417 = vmatpush3.bf16.msra.mxu1 %v2416_v21  ;;  %2449 = vmatprep.subr.bf16.mxu0 %v2644_v15  ;;  %v1243_v21 = vld [vmem:[#allocation7 + $0x178] sm:$0xff] }
 0x51f   :  { %2419 = vmatprep.subr.bf16.mxu1 %v2418_v25  ;;  %2072 = vmatprep.mubr.msk.f32.mxu0 %vm2645_vm1, %v2643_v0  ;;  %v2468_v22 = vpack.c.bf16 %v1243_v21, %v1242_v20  ;;  %v2442_v25 = vpack.c.bf16 %v1227_v24, %v1226_v23  ;;  %v1407_v21 = vsub.s32 5, %v2883_v17 }
 0x521   :  { %2451 = vmatpush3.bf16.msra.mxu0 %v2450_v30 }
 0x522   :  { %2421 = vmatpush3.bf16.msra.mxu1 %v2420_v31  ;;  %2452 = vmatprep.subr.bf16.mxu0 %v2644_v15 }
 0x523   :  { %2423 = vmatprep.subr.bf16.mxu1 %v2422_v56 }
 0x525   :  { %2454 = vmatpush3.bf16.msra.mxu0 %v2453_v63 }
 0x526   :  { %2425 = vmatpush3.bf16.msra.mxu1 %v2424_v1  ;;  %2455 = vmatprep.subr.bf16.mxu0 %v2644_v15 }
 0x527   :  { %2427 = vmatprep.subr.bf16.mxu1 %v2426_v7 }
 0x529   :  { %2457 = vmatpush3.bf16.msra.mxu0 %v2456_v33  ;;  %v2471_v33 = vpack.c.bf16 %v1390_v9, %v1389_v8 }
 0x52a   :  { %2429 = vmatpush3.bf16.msra.mxu1 %v2428_v34  ;;  %2458 = vmatprep.subr.bf16.mxu0 %v2644_v15 }
 0x52b   :  { %2431 = vmatprep.subr.bf16.mxu1 %v2430_v35  ;;  %v1395_v35 = vld [vmem:[#allocation9 + $0x30] sm:$0xff] }
 0x52c   :  { %v2480_v37 = vpack.c.bf16 %v1396_v36, %v1395_v35 }
 0x52d   :  { %2460 = vmatpush3.bf16.msra.mxu0 %v2459_v38  ;;  %v1397_v38 = vld [vmem:[#allocation9 + $0x40] sm:$0xff] }
 0x52e   :  { %2433 = vmatpush3.bf16.msra.mxu1 %v2432_v39  ;;  %2461 = vmatprep.subr.bf16.mxu0 %v2644_v15  ;;  %v1398_v39 = vld [vmem:[#allocation9 + $0x48] sm:$0xff] }
 0x52f   :  { %2435 = vmatprep.subr.bf16.mxu1 %v2434_v45  ;;  %v2483_v40 = vpack.c.bf16 %v1398_v39, %v1397_v38  ;;  %v2489_v45 = vpack.c.bf16 %v1402_v44, %v1401_v43 }
 0x531   :  { %2463 = vmatpush3.bf16.msra.mxu0 %v2462_v42 }
 0x532   :  { %2464 = vmatprep.subr.bf16.mxu0 %v2644_v15  ;;  %2437 = vmatpush3.bf16.msra.mxu1 %v2436_v48  ;;  %v2492_v48 = vpack.c.bf16 %v1404_v47, %v1403_v46 }
 0x533   :  { %2439 = vmatprep.subr.bf16.mxu1 %v2438_v12 }
 0x535   :  { %2466 = vmatpush3.bf16.msra.mxu0 %v2465_v51 }
 0x536   :  { %2467 = vmatprep.subr.bf16.mxu0 %v2644_v15  ;;  %2441 = vmatpush3.bf16.msra.mxu1 %v2440_v16 }
 0x537   :  { %2443 = vmatprep.subr.bf16.mxu1 %v2442_v25 }
 0x539   :  { %2469 = vmatpush3.bf16.msra.mxu0 %v2468_v22 }
 0x53a   :  { %2445 = vmatpush3.bf16.msra.mxu1 %v2444_v28 }
 0x53b   :  { %2470 = vmatprep.subr.bf16.mxu1 %v2644_v15 }
 0x5ef   :  { %v1159_v29 = vpop.f32.mrb[8].mxu0 }
 0x5f0   :  { %v1174_v30 = vrot.slane %v1159_v29, %v2886_v18  ;;  %v1088_v31 = vpop.f32.mrb[6].mxu1  ;;  %v2039_v54 = vpop.f32.mrb[9].mxu0  ;;  %v1189_v59 = vrot.slane %v1159_v29, %v2889_v19 }
 0x5f1   :  { %v1166_v55 = vrot.slane %v1088_v31, %v2886_v18  ;;  %v1090_v56 = vpop.f32.mrb[7].mxu1  ;;  %v1181_v63 = vrot.slane %v1088_v31, %v2889_v19 }
 0x5f2   :  { %v1177_v58 = vmul.f32 %v2987_v61, %v1174_v30  ;;  %v1170_v60 = vrot.slane %v1090_v56, %v2886_v18  ;;  %v1185_v5 = vrot.slane %v1090_v56, %v2889_v19  ;;  %v1392_v18 = vld [vmem:[#allocation9 + $0x18] sm:$0xff]  ;;  %v1393_v19 = vld [vmem:[#allocation9 + $0x20] sm:$0xff] }
 0x5f3   :  { %v1175_v62 = vmul.f32 %v1166_v55, %v2977_v53  ;;  %v2474_v53 = vpack.c.bf16 %v1392_v18, %v1391_v3 }
 0x5f4   :  { %v1192_v1 = vadd.f32 %v1189_v59, %v1177_v58  ;;  %v1176_v2 = vmul.f32 %v1170_v60, %v2982_v57  ;;  %v1394_v57 = vld [vmem:[#allocation9 + $0x28] sm:$0xff] }
 0x5f5   :  { %v1190_v7 = vadd.f32 %v1181_v63, %v1175_v62  ;;  %v2477_v6 = vpack.c.bf16 %v1394_v57, %v1393_v19 }
 0x5f6   :  { %v1195_v10 = vmax.f32 %v1192_v1, 0.0  ;;  %v1191_v32 = vadd.f32 %v1185_v5, %v1176_v2 }
 0x5f7   :  { %v1193_v34 = vmax.f32 %v1190_v7, 0.0 }
 0x5f8   :  { %2073 = vmatmul.mubr.f32.vlgmr.msra.gmra.mrb[10].mxu0 %v1195_v10  ;;  %v1194_v61 = vmax.f32 %v1191_v32, 0.0 }
 0x5fa   :  { %1312 = vmatprep.mubr.f32.mxu1 %v1194_v61 }
 0x5fb   :  { %1313 = vmatmul.mubr.f32.vlgmr.msra.gmra.mrb[8].mxu1 %v1193_v34 }
 0x5fc   :  { %2472 = vmatpush3.bf16.msra.mxu1 %v2471_v33  ;;  %2107 = vmatprep.mubr.msk.f32.mxu1 %vm2645_vm1, %v2643_v0  ;;  %v1399_v0 = vld [vmem:[#allocation9 + $0x50] sm:$0xff] }
 0x5fd   :  { %2473 = vmatprep.subr.bf16.mxu1 %v2644_v15  ;;  %v2486_v42 = vpack.c.bf16 %v1400_v41, %v1399_v0 }
 0x600   :  { %2475 = vmatpush3.bf16.msra.mxu1 %v2474_v53 }
 0x601   :  { %2476 = vmatprep.subr.bf16.mxu1 %v2644_v15 }
 0x604   :  { %2478 = vmatpush3.bf16.msra.mxu1 %v2477_v6 }
 0x605   :  { %2479 = vmatprep.subr.bf16.mxu1 %v2644_v15 }
 0x608   :  { %2481 = vmatpush3.bf16.msra.mxu1 %v2480_v37 }
 0x609   :  { %2482 = vmatprep.subr.bf16.mxu1 %v2644_v15 }
 0x60c   :  { %2484 = vmatpush3.bf16.msra.mxu1 %v2483_v40 }
 0x60d   :  { %2485 = vmatprep.subr.bf16.mxu1 %v2644_v15 }
 0x610   :  { %2487 = vmatpush3.bf16.msra.mxu1 %v2486_v42 }
 0x611   :  { %2488 = vmatprep.subr.bf16.mxu1 %v2644_v15 }
 0x614   :  { %2490 = vmatpush3.bf16.msra.mxu1 %v2489_v45 }
 0x615   :  { %2491 = vmatprep.subr.bf16.mxu1 %v2644_v15  ;;  %v1408_v15 = vrot.slane %v2874_v4, %v1407_v21 }
 0x618   :  { %2493 = vmatpush3.bf16.msra.mxu1 %v2492_v48 }
 0x6cb   :  { %v1384_v50 = vpop.f32.mrb[10].mxu0 }
 0x6cc   :  { %v2074_v51 = vpop.f32.mrb[11].mxu0 }
 0x6ce   :  { %v1933_v52 = vpop.f32.mrb[8].mxu1 }
 0x6cf   :  { %v1934_v12 = vpop.f32.mrb[9].mxu1 }
 0x6d0   :  { %v1935_v13 = vadd.f32 %v1934_v12, %v1933_v52 }
 0x6d2   :  { %v1315_v14 = vadd.f32 %v1935_v13, %v1247_v11 }
 0x6d4   :  { %v1385_v16 = vadd.f32 %v1384_v50, %v1315_v14 }
 0x6d6   :  { %v1388_v20 = vmax.f32 %v1385_v16, 0.0 }
 0x6d8   :  { %2108 = vmatmul.mubr.f32.vlgmr.msra.gmra.mrb[10].mxu1 %v1388_v20 }
 0x7ab   :  { %v1475_v22 = vpop.f32.mrb[10].mxu1 }
 0x7ac   :  { %v1476_v23 = vadd.f32 %v1475_v22, %v1408_v15  ;;  %v2109_v24 = vpop.f32.mrb[11].mxu1 }
 0x7ae   :  { %1479 = vmax.xlane.f32.xlu0 %v1476_v23 }
 0x83b   :  { %v1480_v25 = vpop.xlane.xlu0 %1479 }
 0x83c   :  { %v1481_v26 = vsub.f32 %v1476_v23, %v1480_v25 }
 0x83e   :  { %v1482_v27 = vmul.f32 1.442695, %v1481_v26 }
 0x840   :  { %2512 = vpow2.f32 %v1482_v27 }
 0x84a   :  { %v2513_v28 = vpop.eup %2512 }
 0x84b   :  { %1484 = vadd.xlane.f32.xlu0 %v2513_v28 }
 0x8d8   :  { %v1485_v29 = vpop.xlane.xlu0 %1484 }
 0x8d9   :  { %2514 = vrcp.f32 %v1485_v29 }
 0x8e3   :  { %v2515_v30 = vpop.eup %2514 }
 0x8e4   :  { %v1487_v31 = vmul.f32 %v2515_v30, %v2513_v28 }
 0x8e6   :  { %1488 = vst [vmem:[%s3077_s8] sm:$0xff] %v1487_v31 }
 0x8e7   :  { %1493 = vsyncpa [#allocation3], 1 }
 0x8e8   :  { %1494 = vsyncpa [#allocation5], 1 }
 0x8e9   :  { %1495 = vsyncpa [#allocation8], 1 }

</bundles_post_ra>
